<compile_context>
chip_gen: v7x
topology: tpu7x:2x2x1
jax: 0.10.0
libtpu: 0.0.40
codegen_flags: <defaults>
</compile_context>

<pallas_src>
import functools
import math

import jax
import jax.numpy as jnp
from jax import lax
from jax.experimental import pallas as pl
from jax.experimental.pallas import tpu as pltpu

EPS = 1e-5          # PyTorch BatchNorm2d default eps
KH = KW = 3         # CBR2d defaults: kernel_size=3, stride=1, padding=1
LANE = 128
VMEM_LIMIT = 32 * 1024 * 1024   # safe scoped-VMEM budget on v5e/v6e/v7x


# --------------------------------------------------------------------------
# Kernel 1: 3x3 conv on one row-slab (in-kernel im2col: 9 static slab slices,
#           9 accumulating MXU matmuls with K = Cin) + per-tile per-channel
#           sum / sum-of-squares for BatchNorm statistics.
# --------------------------------------------------------------------------
def conv_stats_kernel(x_ref, w_ref, conv_ref, stats_ref, *, tile_h, W, Cin):
    # x_ref    : (tile_h+2, W+2, Cin)   bf16 NHWC input slab (1-pixel halo)
    # w_ref    : (9, Cin, Cout_p)       bf16 conv taps (tap = kh*3 + kw)
    # conv_ref : (tile_h*W, Cout_p)     bf16 conv output tile
    # stats_ref: (2, Cout_p)            f32  [sum, sum-of-squares] of this tile
    rows = tile_h * W
    cout_p = w_ref.shape[-1]
    acc = jnp.zeros((rows, cout_p), jnp.float32)
    for kh in range(KH):
        for kw in range(KW):
            a = x_ref[kh:kh + tile_h, kw:kw + W, :]            # (tile_h, W, Cin)
            a = a.reshape(rows, Cin)                           # major-dim collapse
            acc += jnp.dot(a, w_ref[kh * KW + kw],
                           preferred_element_type=jnp.float32)
    # Stats from the f32 accumulator (before the bf16 cast); direct row stores.
    stats_ref[0:1, :] = jnp.sum(acc, axis=0, keepdims=True)
    stats_ref[1:2, :] = jnp.sum(acc * acc, axis=0, keepdims=True)
    conv_ref[...] = acc.astype(conv_ref.dtype)                 # bf16 intermediate


# --------------------------------------------------------------------------
# Kernel 2: fused BatchNorm apply (single per-channel scale+shift) + ReLU,
#           writing a transposed block so the final layout is NCHW directly.
# --------------------------------------------------------------------------
def bn_relu_kernel(conv_ref, scale_ref, shift_ref, o_ref):
    # conv_ref : (rows, Cout_p)  bf16
    # scale_ref: (1, Cout_p)     f32    gamma * rsqrt(var + eps)
    # shift_ref: (1, Cout_p)     f32    beta  - mean * scale
    # o_ref    : (Cout_p, rows)  f32    (N, Cout_p, H*W) output layout
    y = conv_ref[...].astype(jnp.float32) * scale_ref[...] + shift_ref[...]
    y = jnp.maximum(y, 0.0)
    o_ref[...] = jnp.transpose(y, (1, 0))      # XLU transpose, hidden under HBM


def _pick_tile_h(H, W, max_rows):
    """Largest tile_h with (tile_h*W) % 128 == 0 and tile_h*W <= max_rows.

    Returns None when no such tile fits -> fall back to one slab per image
    (then the row tile equals the full H*W dim, which is always legal).
    """
    step = 128 // math.gcd(W, 128)
    if step > H or step * W > max_rows:
        return None
    k = min(H // step, max(1, max_rows // (step * W)))
    return step * k


def cbr2d(x_nchw, weight, bias, gamma, beta, *, tile_h=None, max_rows=2048):
    """CBR2d forward. x_nchw: (N, Cin, H, W); weight: (Cout, Cin, 3, 3)."""
    # BatchNorm's batch-mean subtraction cancels the conv bias exactly in the
    # train-mode forward pass, so it is dropped.  (Padded rows/channels then
    # contribute exactly zero to the statistics as well.)
    del bias
    N, Cin, H, W = x_nchw.shape
    Cout = weight.shape[0]

    if tile_h is None:
        tile_h = _pick_tile_h(H, W, max_rows)
    if tile_h is None or tile_h >= H:
        tile_h = H                               # single slab per image
    n_slabs = (H + tile_h - 1) // tile_h
    H_p = n_slabs * tile_h
    rows = tile_h * W                            # conv rows per grid step
    hw_p = H_p * W
    cout_p = ((Cout + LANE - 1) // LANE) * LANE
    if n_slabs > 1 and rows % LANE != 0:
        raise ValueError(f"tile_h*W ({rows}) must be a multiple of 128 "
                         f"when tiling H (tile_h={tile_h}, W={W})")

    # ------------- wrapper glue (plain JAX, ~1x the input in HBM) -------------
    # NHWC + bf16 cast (one pass), halo pad, then overlapping row slabs.
    x = jnp.transpose(x_nchw, (0, 2, 3, 1)).astype(jnp.bfloat16)
    xp = jnp.pad(x, ((0, 0), (1, 1 + H_p - H), (1, 1), (0, 0)))
    slabs = jnp.stack([xp[:, i * tile_h: i * tile_h + tile_h + 2]
                       for i in range(n_slabs)], axis=1)
    # slabs: (N, n_slabs, tile_h+2, W+2, Cin)

    # weight[tap, cin, cout] with tap = kh*3 + kw, Cout padded to 128 lanes.
    w = jnp.transpose(weight, (2, 3, 1, 0)).reshape(KH * KW, Cin, Cout)
    w = jnp.pad(w, ((0, 0), (0, 0), (0, cout_p - Cout))).astype(jnp.bfloat16)

    # ---------------- phase 1: conv + per-tile BN statistics -------------------
    kern1 = functools.partial(conv_stats_kernel, tile_h=tile_h, W=W, Cin=Cin)
    conv_bf16, stats = pl.pallas_call(
        kern1,
        out_shape=(jax.ShapeDtypeStruct((N, hw_p, cout_p), jnp.bfloat16),
                   jax.ShapeDtypeStruct((N, n_slabs, 2, cout_p), jnp.float32)),
        grid_spec=pltpu.PrefetchScalarGridSpec(
            num_scalar_prefetch=0,
            grid=(N, n_slabs),
            in_specs=[
                pl.BlockSpec((None, None, tile_h + 2, W + 2, Cin),
                             lambda n, i: (n, i, 0, 0, 0)),
                pl.BlockSpec((KH * KW, Cin, cout_p), lambda n, i: (0, 0, 0)),
            ],
            out_specs=(
                pl.BlockSpec((None, rows, cout_p), lambda n, i: (n, i, 0)),
                pl.BlockSpec((None, None, 2, cout_p), lambda n, i: (n, i, 0, 0)),
            )),
        compiler_params=pltpu.CompilerParams(
            dimension_semantics=("parallel", "parallel"),
            vmem_limit_bytes=VMEM_LIMIT),
    )(slabs, w)

    # ---------------- reduce stats, fold BN into one scale+shift ---------------
    count = jnp.float32(N * H * W)               # true count (padded rows are 0)
    total = jnp.sum(stats, axis=(0, 1))          # (2, Cout_p), f32
    mean = total[0] / count
    # NOTE: E[x^2] - mean^2 in f32; adequate here.  For very large N*H*W with
    # large means, switch to a two-pass (mean, then centered sumsq) reduction.
    var = jnp.maximum(total[1] / count - mean * mean, 0.0)
    gamma_p = jnp.pad(gamma.astype(jnp.float32), (0, cout_p - Cout))
    beta_p = jnp.pad(beta.astype(jnp.float32), (0, cout_p - Cout))
    scale = gamma_p * lax.rsqrt(var + EPS)
    shift = beta_p - mean * scale

    # --------- phase 2: scale/shift + ReLU, written directly as NCHW -----------
    out_p = pl.pallas_call(
        bn_relu_kernel,
        out_shape=jax.ShapeDtypeStruct((N, cout_p, hw_p), jnp.float32),
        grid_spec=pltpu.PrefetchScalarGridSpec(
            num_scalar_prefetch=0,
            grid=(N, n_slabs),
            in_specs=[
                pl.BlockSpec((None, rows, cout_p), lambda n, i: (n, i, 0)),
                pl.BlockSpec((1, cout_p), lambda n, i: (0, 0)),
                pl.BlockSpec((1, cout_p), lambda n, i: (0, 0)),
            ],
            out_specs=pl.BlockSpec((None, cout_p, rows), lambda n, i: (n, 0, i))),
        compiler_params=pltpu.CompilerParams(
            dimension_semantics=("parallel", "parallel"),
            vmem_limit_bytes=VMEM_LIMIT),
    )(conv_bf16, scale.reshape(1, cout_p), shift.reshape(1, cout_p))

    # Free when Cout is a multiple of 128 and H divides by tile_h (typical
    # ResNet shapes); otherwise a single output-sized slice copy.
    return out_p[:, :Cout, :H * W].reshape(N, Cout, H, W)


# ----------------------- pure-JAX reference (for checking) -----------------------
def cbr2d_reference(x, weight, bias, gamma, beta):
    y = lax.conv_general_dilated(
        x, weight, window_strides=(1, 1), padding=((1, 1), (1, 1)),
        dimension_numbers=("NCHW", "OIHW", "NCHW"))
    y = y + bias[None, :, None, None]
    mean = jnp.mean(y, axis=(0, 2, 3), keepdims=True)
    var = jnp.mean((y - mean) ** 2, axis=(0, 2, 3), keepdims=True)
    y = (y - mean) * lax.rsqrt(var + EPS)
    y = y * gamma[None, :, None, None] + beta[None, :, None, None]
    return jnp.maximum(y, 0.0)


if __name__ == "__main__":
    # Deterministic synthetic parameters / inputs (small shapes).
    N, Cin, H, W = 2, 4, 16, 16
    Cout = 8

    key = jax.random.PRNGKey(0)
    kx, kw_, kb, kg, kbe = jax.random.split(key, 5)

    x = jax.random.normal(kx, (N, Cin, H, W), dtype=jnp.float32)
    weight = 0.1 * jax.random.normal(kw_, (Cout, Cin, KH, KW), dtype=jnp.float32)
    bias = 0.05 * jax.random.normal(kb, (Cout,), dtype=jnp.float32)
    gamma = 1.0 + 0.1 * jax.random.normal(kg, (Cout,), dtype=jnp.float32)
    beta = 0.1 * jax.random.normal(kbe, (Cout,), dtype=jnp.float32)

    # tile_h=8 -> 2 slabs per image (4-step grid) to exercise multi-tile paths
    # at this toy size; production sizing is handled by _pick_tile_h.
    fwd = jax.jit(functools.partial(cbr2d, tile_h=8))
    out = jax.block_until_ready(fwd(x, weight, bias, gamma, beta))

    assert out.shape == (N, Cout, H, W)
    assert bool(jnp.all(out >= 0.0))          # ReLU post-condition

    ref = cbr2d_reference(x, weight, bias, gamma, beta)
    max_err = float(jnp.max(jnp.abs(out - ref)))
    assert max_err < 5e-2, f"max abs error vs reference: {max_err}"
    print("KERNEL_OK")
</pallas_src>

<mosaic_0001>
module attributes {stable_mosaic.version = 11 : i64} {
  func.func @bn_relu_kernel(%arg0: i32, %arg1: i32, %arg2: memref<1x128x128xbf16, #tpu.memory_space<vmem>>, %arg3: memref<1x128xf32, #tpu.memory_space<vmem>>, %arg4: memref<1x128xf32, #tpu.memory_space<vmem>>, %arg5: memref<1x128x128xf32, #tpu.memory_space<vmem>>) attributes {dimension_semantics = [#tpu.dimension_semantics<parallel>, #tpu.dimension_semantics<parallel>], iteration_bounds = array<i64: 2, 2>, scalar_prefetch = 0 : i64, scratch_operands = 0 : i64, tpu.core_type = #tpu.core_type<tc>, window_params = [{transform_indices = @transform_0, window_bounds = array<i64: 1, 128, 128>}, {pipeline_mode = #tpu.pipeline_mode<synchronous>, transform_indices = @transform_1, window_bounds = array<i64: 1, 128>}, {pipeline_mode = #tpu.pipeline_mode<synchronous>, transform_indices = @transform_2, window_bounds = array<i64: 1, 128>}, {transform_indices = @transform_3, window_bounds = array<i64: 1, 128, 128>}]} {
    %c0 = arith.constant 0 : index
    %c0_0 = arith.constant 0 : index
    %c0_1 = arith.constant 0 : index
    %0 = vector.load %arg2[%c0, %c0_0, %c0_1] : memref<1x128x128xbf16, #tpu.memory_space<vmem>>, vector<1x128x128xbf16>
    %1 = vector.shape_cast %0 : vector<1x128x128xbf16> to vector<128x128xbf16>
    %2 = arith.extf %1 : vector<128x128xbf16> to vector<128x128xf32>
    %c0_2 = arith.constant 0 : index
    %c0_3 = arith.constant 0 : index
    %3 = vector.load %arg3[%c0_2, %c0_3] : memref<1x128xf32, #tpu.memory_space<vmem>>, vector<1x128xf32>
    %4 = vector.broadcast %3 : vector<1x128xf32> to vector<128x128xf32>
    %5 = arith.mulf %2, %4 : vector<128x128xf32>
    %c0_4 = arith.constant 0 : index
    %c0_5 = arith.constant 0 : index
    %6 = vector.load %arg4[%c0_4, %c0_5] : memref<1x128xf32, #tpu.memory_space<vmem>>, vector<1x128xf32>
    %7 = vector.broadcast %6 : vector<1x128xf32> to vector<128x128xf32>
    %8 = arith.addf %5, %7 : vector<128x128xf32>
    %cst = arith.constant 0.000000e+00 : f32
    %9 = vector.broadcast %cst : f32 to vector<128x128xf32>
    %10 = arith.maximumf %8, %9 : vector<128x128xf32>
    %11 = tpu.transpose %10, [1, 0] : vector<128x128xf32> -> vector<128x128xf32>
    %c0_6 = arith.constant 0 : index
    %c0_7 = arith.constant 0 : index
    %c0_8 = arith.constant 0 : index
    %12 = vector.load %arg5[%c0_6, %c0_7, %c0_8] : memref<1x128x128xf32, #tpu.memory_space<vmem>>, vector<1x128x128xf32>
    %13 = vector.shape_cast %12 : vector<1x128x128xf32> to vector<128x128xf32>
    %14 = vector.shape_cast %11 : vector<128x128xf32> to vector<1x128x128xf32>
    tpu.vector_store %arg5[%c0_6, %c0_7, %c0_8], %14 {strides = array<i32>} : memref<1x128x128xf32, #tpu.memory_space<vmem>>, vector<1x128x128xf32>,
    return
  }
  func.func @transform_0(%arg0: i32, %arg1: i32) -> (i32, i32, i32) {
    %c0_i32 = arith.constant 0 : i32
    %c0_i32_0 = arith.constant 0 : i32
    return %arg0, %arg1, %c0_i32 : i32, i32, i32
  }
  func.func @transform_1(%arg0: i32, %arg1: i32) -> (i32, i32) {
    %c0_i32 = arith.constant 0 : i32
    %c0_i32_0 = arith.constant 0 : i32
    %c0_i32_1 = arith.constant 0 : i32
    return %c0_i32, %c0_i32_0 : i32, i32
  }
  func.func @transform_2(%arg0: i32, %arg1: i32) -> (i32, i32) {
    %c0_i32 = arith.constant 0 : i32
    %c0_i32_0 = arith.constant 0 : i32
    %c0_i32_1 = arith.constant 0 : i32
    return %c0_i32, %c0_i32_0 : i32, i32
  }
  func.func @transform_3(%arg0: i32, %arg1: i32) -> (i32, i32, i32) {
    %c0_i32 = arith.constant 0 : i32
    %c0_i32_0 = arith.constant 0 : i32
    return %arg0, %c0_i32, %arg1 : i32, i32, i32
  }
}

module attributes {stable_mosaic.version = 11 : i64} {
  func.func @conv_stats_kernel(%arg0: i32, %arg1: i32, %arg2: memref<1x1x10x18x4xbf16, #tpu.memory_space<vmem>>, %arg3: memref<9x4x128xbf16, #tpu.memory_space<vmem>>, %arg4: memref<1x128x128xbf16, #tpu.memory_space<vmem>>, %arg5: memref<1x1x2x128xf32, #tpu.memory_space<vmem>>) attributes {dimension_semantics = [#tpu.dimension_semantics<parallel>, #tpu.dimension_semantics<parallel>], iteration_bounds = array<i64: 2, 2>, scalar_prefetch = 0 : i64, scratch_operands = 0 : i64, tpu.core_type = #tpu.core_type<tc>, window_params = [{transform_indices = @transform_0, window_bounds = array<i64: 1, 1, 10, 18, 4>}, {pipeline_mode = #tpu.pipeline_mode<synchronous>, transform_indices = @transform_1, window_bounds = array<i64: 9, 4, 128>}, {transform_indices = @transform_2, window_bounds = array<i64: 1, 128, 128>}, {transform_indices = @transform_3, window_bounds = array<i64: 1, 1, 2, 128>}]} {
    %cst = arith.constant 0.000000e+00 : f32
    %0 = vector.broadcast %cst : f32 to vector<128x128xf32>
    %c0 = arith.constant 0 : index
    %c0_0 = arith.constant 0 : index
    %c0_1 = arith.constant 0 : index
    %c0_2 = arith.constant 0 : index
    %c0_3 = arith.constant 0 : index
    %1 = vector.load %arg2[%c0, %c0_0, %c0_1, %c0_2, %c0_3] : memref<1x1x10x18x4xbf16, #tpu.memory_space<vmem>>, vector<1x1x8x16x4xbf16>
    %2 = vector.shape_cast %1 : vector<1x1x8x16x4xbf16> to vector<8x16x4xbf16>
    %3 = vector.shape_cast %2 : vector<8x16x4xbf16> to vector<128x4xbf16>
    %c0_4 = arith.constant 0 : index
    %c0_5 = arith.constant 0 : index
    %c0_6 = arith.constant 0 : index
    %4 = vector.load %arg3[%c0_4, %c0_5, %c0_6] : memref<9x4x128xbf16, #tpu.memory_space<vmem>>, vector<1x4x128xbf16>
    %5 = vector.shape_cast %4 : vector<1x4x128xbf16> to vector<4x128xbf16>
    %cst_7 = arith.constant dense<0.000000e+00> : vector<128x128xf32>
    %6 = tpu.matmul %3, %5, %cst_7 {dimension_numbers = #tpu.dot_dimension_numbers<[1], [0], [0], [1], [0, 0, 1, 1], [], []>} : vector<128x4xbf16>, vector<4x128xbf16>, vector<128x128xf32> -> vector<128x128xf32>
    %7 = arith.addf %0, %6 : vector<128x128xf32>
    %c0_8 = arith.constant 0 : index
    %c0_9 = arith.constant 0 : index
    %c0_10 = arith.constant 0 : index
    %c1 = arith.constant 1 : index
    %c0_11 = arith.constant 0 : index
    %8 = vector.load %arg2[%c0_8, %c0_9, %c0_10, %c1, %c0_11] : memref<1x1x10x18x4xbf16, #tpu.memory_space<vmem>>, vector<1x1x8x16x4xbf16>
    %9 = vector.shape_cast %8 : vector<1x1x8x16x4xbf16> to vector<8x16x4xbf16>
    %10 = vector.shape_cast %9 : vector<8x16x4xbf16> to vector<128x4xbf16>
    %c1_12 = arith.constant 1 : index
    %c0_13 = arith.constant 0 : index
    %c0_14 = arith.constant 0 : index
    %11 = vector.load %arg3[%c1_12, %c0_13, %c0_14] : memref<9x4x128xbf16, #tpu.memory_space<vmem>>, vector<1x4x128xbf16>
    %12 = vector.shape_cast %11 : vector<1x4x128xbf16> to vector<4x128xbf16>
    %cst_15 = arith.constant dense<0.000000e+00> : vector<128x128xf32>
    %13 = tpu.matmul %10, %12, %cst_15 {dimension_numbers = #tpu.dot_dimension_numbers<[1], [0], [0], [1], [0, 0, 1, 1], [], []>} : vector<128x4xbf16>, vector<4x128xbf16>, vector<128x128xf32> -> vector<128x128xf32>
    %14 = arith.addf %7, %13 : vector<128x128xf32>
    %c0_16 = arith.constant 0 : index
    %c0_17 = arith.constant 0 : index
    %c0_18 = arith.constant 0 : index
    %c2 = arith.constant 2 : index
    %c0_19 = arith.constant 0 : index
    %15 = vector.load %arg2[%c0_16, %c0_17, %c0_18, %c2, %c0_19] : memref<1x1x10x18x4xbf16, #tpu.memory_space<vmem>>, vector<1x1x8x16x4xbf16>
    %16 = vector.shape_cast %15 : vector<1x1x8x16x4xbf16> to vector<8x16x4xbf16>
    %17 = vector.shape_cast %16 : vector<8x16x4xbf16> to vector<128x4xbf16>
    %c2_20 = arith.constant 2 : index
    %c0_21 = arith.constant 0 : index
    %c0_22 = arith.constant 0 : index
    %18 = vector.load %arg3[%c2_20, %c0_21, %c0_22] : memref<9x4x128xbf16, #tpu.memory_space<vmem>>, vector<1x4x128xbf16>
    %19 = vector.shape_cast %18 : vector<1x4x128xbf16> to vector<4x128xbf16>
    %cst_23 = arith.constant dense<0.000000e+00> : vector<128x128xf32>
    %20 = tpu.matmul %17, %19, %cst_23 {dimension_numbers = #tpu.dot_dimension_numbers<[1], [0], [0], [1], [0, 0, 1, 1], [], []>} : vector<128x4xbf16>, vector<4x128xbf16>, vector<128x128xf32> -> vector<128x128xf32>
    %21 = arith.addf %14, %20 : vector<128x128xf32>
    %c0_24 = arith.constant 0 : index
    %c0_25 = arith.constant 0 : index
    %c1_26 = arith.constant 1 : index
    %c0_27 = arith.constant 0 : index
    %c0_28 = arith.constant 0 : index
    %22 = vector.load %arg2[%c0_24, %c0_25, %c1_26, %c0_27, %c0_28] : memref<1x1x10x18x4xbf16, #tpu.memory_space<vmem>>, vector<1x1x8x16x4xbf16>
    %23 = vector.shape_cast %22 : vector<1x1x8x16x4xbf16> to vector<8x16x4xbf16>
    %24 = vector.shape_cast %23 : vector<8x16x4xbf16> to vector<128x4xbf16>
    %c3 = arith.constant 3 : index
    %c0_29 = arith.constant 0 : index
    %c0_30 = arith.constant 0 : index
    %25 = vector.load %arg3[%c3, %c0_29, %c0_30] : memref<9x4x128xbf16, #tpu.memory_space<vmem>>, vector<1x4x128xbf16>
    %26 = vector.shape_cast %25 : vector<1x4x128xbf16> to vector<4x128xbf16>
    %cst_31 = arith.constant dense<0.000000e+00> : vector<128x128xf32>
    %27 = tpu.matmul %24, %26, %cst_31 {dimension_numbers = #tpu.dot_dimension_numbers<[1], [0], [0], [1], [0, 0, 1, 1], [], []>} : vector<128x4xbf16>, vector<4x128xbf16>, vector<128x128xf32> -> vector<128x128xf32>
    %28 = arith.addf %21, %27 : vector<128x128xf32>
    %c0_32 = arith.constant 0 : index
    %c0_33 = arith.constant 0 : index
    %c1_34 = arith.constant 1 : index
    %c1_35 = arith.constant 1 : index
    %c0_36 = arith.constant 0 : index
    %29 = vector.load %arg2[%c0_32, %c0_33, %c1_34, %c1_35, %c0_36] : memref<1x1x10x18x4xbf16, #tpu.memory_space<vmem>>, vector<1x1x8x16x4xbf16>
    %30 = vector.shape_cast %29 : vector<1x1x8x16x4xbf16> to vector<8x16x4xbf16>
    %31 = vector.shape_cast %30 : vector<8x16x4xbf16> to vector<128x4xbf16>
    %c4 = arith.constant 4 : index
    %c0_37 = arith.constant 0 : index
    %c0_38 = arith.constant 0 : index
    %32 = vector.load %arg3[%c4, %c0_37, %c0_38] : memref<9x4x128xbf16, #tpu.memory_space<vmem>>, vector<1x4x128xbf16>
    %33 = vector.shape_cast %32 : vector<1x4x128xbf16> to vector<4x128xbf16>
    %cst_39 = arith.constant dense<0.000000e+00> : vector<128x128xf32>
    %34 = tpu.matmul %31, %33, %cst_39 {dimension_numbers = #tpu.dot_dimension_numbers<[1], [0], [0], [1], [0, 0, 1, 1], [], []>} : vector<128x4xbf16>, vector<4x128xbf16>, vector<128x128xf32> -> vector<128x128xf32>
    %35 = arith.addf %28, %34 : vector<128x128xf32>
    %c0_40 = arith.constant 0 : index
    %c0_41 = arith.constant 0 : index
    %c1_42 = arith.constant 1 : index
    %c2_43 = arith.constant 2 : index
    %c0_44 = arith.constant 0 : index
    %36 = vector.load %arg2[%c0_40, %c0_41, %c1_42, %c2_43, %c0_44] : memref<1x1x10x18x4xbf16, #tpu.memory_space<vmem>>, vector<1x1x8x16x4xbf16>
    %37 = vector.shape_cast %36 : vector<1x1x8x16x4xbf16> to vector<8x16x4xbf16>
    %38 = vector.shape_cast %37 : vector<8x16x4xbf16> to vector<128x4xbf16>
    %c5 = arith.constant 5 : index
    %c0_45 = arith.constant 0 : index
    %c0_46 = arith.constant 0 : index
    %39 = vector.load %arg3[%c5, %c0_45, %c0_46] : memref<9x4x128xbf16, #tpu.memory_space<vmem>>, vector<1x4x128xbf16>
    %40 = vector.shape_cast %39 : vector<1x4x128xbf16> to vector<4x128xbf16>
    %cst_47 = arith.constant dense<0.000000e+00> : vector<128x128xf32>
    %41 = tpu.matmul %38, %40, %cst_47 {dimension_numbers = #tpu.dot_dimension_numbers<[1], [0], [0], [1], [0, 0, 1, 1], [], []>} : vector<128x4xbf16>, vector<4x128xbf16>, vector<128x128xf32> -> vector<128x128xf32>
    %42 = arith.addf %35, %41 : vector<128x128xf32>
    %c0_48 = arith.constant 0 : index
    %c0_49 = arith.constant 0 : index
    %c2_50 = arith.constant 2 : index
    %c0_51 = arith.constant 0 : index
    %c0_52 = arith.constant 0 : index
    %43 = vector.load %arg2[%c0_48, %c0_49, %c2_50, %c0_51, %c0_52] : memref<1x1x10x18x4xbf16, #tpu.memory_space<vmem>>, vector<1x1x8x16x4xbf16>
    %44 = vector.shape_cast %43 : vector<1x1x8x16x4xbf16> to vector<8x16x4xbf16>
    %45 = vector.shape_cast %44 : vector<8x16x4xbf16> to vector<128x4xbf16>
    %c6 = arith.constant 6 : index
    %c0_53 = arith.constant 0 : index
    %c0_54 = arith.constant 0 : index
    %46 = vector.load %arg3[%c6, %c0_53, %c0_54] : memref<9x4x128xbf16, #tpu.memory_space<vmem>>, vector<1x4x128xbf16>
    %47 = vector.shape_cast %46 : vector<1x4x128xbf16> to vector<4x128xbf16>
    %cst_55 = arith.constant dense<0.000000e+00> : vector<128x128xf32>
    %48 = tpu.matmul %45, %47, %cst_55 {dimension_numbers = #tpu.dot_dimension_numbers<[1], [0], [0], [1], [0, 0, 1, 1], [], []>} : vector<128x4xbf16>, vector<4x128xbf16>, vector<128x128xf32> -> vector<128x128xf32>
    %49 = arith.addf %42, %48 : vector<128x128xf32>
    %c0_56 = arith.constant 0 : index
    %c0_57 = arith.constant 0 : index
    %c2_58 = arith.constant 2 : index
    %c1_59 = arith.constant 1 : index
    %c0_60 = arith.constant 0 : index
    %50 = vector.load %arg2[%c0_56, %c0_57, %c2_58, %c1_59, %c0_60] : memref<1x1x10x18x4xbf16, #tpu.memory_space<vmem>>, vector<1x1x8x16x4xbf16>
    %51 = vector.shape_cast %50 : vector<1x1x8x16x4xbf16> to vector<8x16x4xbf16>
    %52 = vector.shape_cast %51 : vector<8x16x4xbf16> to vector<128x4xbf16>
    %c7 = arith.constant 7 : index
    %c0_61 = arith.constant 0 : index
    %c0_62 = arith.constant 0 : index
    %53 = vector.load %arg3[%c7, %c0_61, %c0_62] : memref<9x4x128xbf16, #tpu.memory_space<vmem>>, vector<1x4x128xbf16>
    %54 = vector.shape_cast %53 : vector<1x4x128xbf16> to vector<4x128xbf16>
    %cst_63 = arith.constant dense<0.000000e+00> : vector<128x128xf32>
    %55 = tpu.matmul %52, %54, %cst_63 {dimension_numbers = #tpu.dot_dimension_numbers<[1], [0], [0], [1], [0, 0, 1, 1], [], []>} : vector<128x4xbf16>, vector<4x128xbf16>, vector<128x128xf32> -> vector<128x128xf32>
    %56 = arith.addf %49, %55 : vector<128x128xf32>
    %c0_64 = arith.constant 0 : index
    %c0_65 = arith.constant 0 : index
    %c2_66 = arith.constant 2 : index
    %c2_67 = arith.constant 2 : index
    %c0_68 = arith.constant 0 : index
    %57 = vector.load %arg2[%c0_64, %c0_65, %c2_66, %c2_67, %c0_68] : memref<1x1x10x18x4xbf16, #tpu.memory_space<vmem>>, vector<1x1x8x16x4xbf16>
    %58 = vector.shape_cast %57 : vector<1x1x8x16x4xbf16> to vector<8x16x4xbf16>
    %59 = vector.shape_cast %58 : vector<8x16x4xbf16> to vector<128x4xbf16>
    %c8 = arith.constant 8 : index
    %c0_69 = arith.constant 0 : index
    %c0_70 = arith.constant 0 : index
    %60 = vector.load %arg3[%c8, %c0_69, %c0_70] : memref<9x4x128xbf16, #tpu.memory_space<vmem>>, vector<1x4x128xbf16>
    %61 = vector.shape_cast %60 : vector<1x4x128xbf16> to vector<4x128xbf16>
    %cst_71 = arith.constant dense<0.000000e+00> : vector<128x128xf32>
    %62 = tpu.matmul %59, %61, %cst_71 {dimension_numbers = #tpu.dot_dimension_numbers<[1], [0], [0], [1], [0, 0, 1, 1], [], []>} : vector<128x4xbf16>, vector<4x128xbf16>, vector<128x128xf32> -> vector<128x128xf32>
    %63 = arith.addf %56, %62 : vector<128x128xf32>
    %cst_72 = arith.constant dense<0.000000e+00> : vector<128xf32>
    %64 = vector.multi_reduction <add>, %63, %cst_72 [0] : vector<128x128xf32> to vector<128xf32>
    %65 = vector.shape_cast %64 : vector<128xf32> to vector<1x128xf32>
    %c0_73 = arith.constant 0 : index
    %c0_74 = arith.constant 0 : index
    %c0_75 = arith.constant 0 : index
    %c0_76 = arith.constant 0 : index
    %66 = vector.load %arg5[%c0_73, %c0_74, %c0_75, %c0_76] : memref<1x1x2x128xf32, #tpu.memory_space<vmem>>, vector<1x1x1x128xf32>
    %67 = vector.shape_cast %66 : vector<1x1x1x128xf32> to vector<1x128xf32>
    %68 = vector.shape_cast %65 : vector<1x128xf32> to vector<1x1x1x128xf32>
    tpu.vector_store %arg5[%c0_73, %c0_74, %c0_75, %c0_76], %68 {strides = array<i32>} : memref<1x1x2x128xf32, #tpu.memory_space<vmem>>, vector<1x1x1x128xf32>,
    %69 = arith.mulf %63, %63 : vector<128x128xf32>
    %cst_77 = arith.constant dense<0.000000e+00> : vector<128xf32>
    %70 = vector.multi_reduction <add>, %69, %cst_77 [0] : vector<128x128xf32> to vector<128xf32>
    %71 = vector.shape_cast %70 : vector<128xf32> to vector<1x128xf32>
    %c0_78 = arith.constant 0 : index
    %c0_79 = arith.constant 0 : index
    %c1_80 = arith.constant 1 : index
    %c0_81 = arith.constant 0 : index
    %72 = vector.load %arg5[%c0_78, %c0_79, %c1_80, %c0_81] : memref<1x1x2x128xf32, #tpu.memory_space<vmem>>, vector<1x1x1x128xf32>
    %73 = vector.shape_cast %72 : vector<1x1x1x128xf32> to vector<1x128xf32>
    %74 = vector.shape_cast %71 : vector<1x128xf32> to vector<1x1x1x128xf32>
    tpu.vector_store %arg5[%c0_78, %c0_79, %c1_80, %c0_81], %74 {strides = array<i32>} : memref<1x1x2x128xf32, #tpu.memory_space<vmem>>, vector<1x1x1x128xf32>,
    %75 = arith.truncf %63 : vector<128x128xf32> to vector<128x128xbf16>
    %c0_82 = arith.constant 0 : index
    %c0_83 = arith.constant 0 : index
    %c0_84 = arith.constant 0 : index
    %76 = vector.load %arg4[%c0_82, %c0_83, %c0_84] : memref<1x128x128xbf16, #tpu.memory_space<vmem>>, vector<1x128x128xbf16>
    %77 = vector.shape_cast %76 : vector<1x128x128xbf16> to vector<128x128xbf16>
    %78 = vector.shape_cast %75 : vector<128x128xbf16> to vector<1x128x128xbf16>
    tpu.vector_store %arg4[%c0_82, %c0_83, %c0_84], %78 {strides = array<i32>} : memref<1x128x128xbf16, #tpu.memory_space<vmem>>, vector<1x128x128xbf16>,
    return
  }
  func.func @transform_0(%arg0: i32, %arg1: i32) -> (i32, i32, i32, i32, i32) {
    %c0_i32 = arith.constant 0 : i32
    %c0_i32_0 = arith.constant 0 : i32
    %c0_i32_1 = arith.constant 0 : i32
    %c0_i32_2 = arith.constant 0 : i32
    return %arg0, %arg1, %c0_i32, %c0_i32_0, %c0_i32_1 : i32, i32, i32, i32, i32
  }
  func.func @transform_1(%arg0: i32, %arg1: i32) -> (i32, i32, i32) {
    %c0_i32 = arith.constant 0 : i32
    %c0_i32_0 = arith.constant 0 : i32
    %c0_i32_1 = arith.constant 0 : i32
    %c0_i32_2 = arith.constant 0 : i32
    return %c0_i32, %c0_i32_0, %c0_i32_1 : i32, i32, i32
  }
  func.func @transform_2(%arg0: i32, %arg1: i32) -> (i32, i32, i32) {
    %c0_i32 = arith.constant 0 : i32
    %c0_i32_0 = arith.constant 0 : i32
    return %arg0, %arg1, %c0_i32 : i32, i32, i32
  }
  func.func @transform_3(%arg0: i32, %arg1: i32) -> (i32, i32, i32, i32) {
    %c0_i32 = arith.constant 0 : i32
    %c0_i32_0 = arith.constant 0 : i32
    %c0_i32_1 = arith.constant 0 : i32
    return %arg0, %arg1, %c0_i32, %c0_i32_0 : i32, i32, i32, i32
  }
}

</mosaic_0001>

<bundles_post_ra>
// kernel: cbr2d.3
= control target key start
LH: loop header
LB: loop body
LE: loop exit
PB: predicated region body
PF: predicated region fallthrough
CT: control target
= control target key end

     0   :  { %s697_s12 = smov 0   ;;  %s699_s13 = smov 0   ;;  %s877_s0 = inlined_call_operand.vmem [shape: bf16[2,256,128], index: 0, kind: input, shape index: {}]   ;;  %s878_s1 = inlined_call_operand.vmem [shape: f32[1,128], index: 1, kind: input, shape index: {}]   ;;  %s879_s2 = inlined_call_operand.vmem [shape: f32[1,128], index: 2, kind: input, shape index: {}]   ;;  %s880_s3 = inlined_call_operand.vmem [shape: f32[2,128,256], index: 3, kind: output, shape index: {}]  }
   0x1   :  { %s701_s14 = smov 0   ;;  %s703_s15 = smov 0  }
   0x2   :  { %s705_s16 = smov 0   ;;  %s707_s17 = smov 0  }
   0x3   :  { %s709_s18 = smov 0  }
   0x4 LB: > { %s22_s19 = sadd.s32 1, %s667_s16  ;;  %s25_s20 = sadd.s32 1, %s671_s17  ;;  %s675_s18 = sphi %s709_s18, %s13_s18   ;;  %s671_s17 = sphi %s707_s17, %s887_s17   ;;  %s667_s16 = sphi %s705_s16, %s886_s16   ;;  %s663_s15 = sphi %s703_s15, %s885_s15   ;;  %s659_s14 = sphi %s701_s14, %s884_s14   ;;  %s655_s13 = sphi %s699_s13, %s883_s13   ;;  %s651_s12 = sphi %s697_s12, %s882_s12  }
   0x5   : > { %p23_p0 = scmp.ge.s32.totalorder %s22_s19, 2  ;;  %s510_s21 = sadd.s32 4294967295, %s675_s18  }
   0x6   : > { %p114_p1 = scmp.ne.s32.totalorder %s655_s13, %s651_s12  ;;  %p115_p2 = scmp.eq.s32.totalorder %s510_s21, 3 }
   0x7   : > { %s889_s19 = smov (%p23_p0, %s22_s19), 0  ;;  %s891_s20 = smov (!%p23_p0, %s25_s20), %s671_s17 }
   0x8   : > { %s100_s22 = ssub.s32 %s667_s16, %s889_s19  ;;  %p27_p3 = scmp.ge.s32.totalorder %s891_s20, 2 }
   0x9   : > { %p514_p4 = scmp.ge.s32.totalorder %s675_s18, 1  ;;  %p743_p5 = por %p115_p2, %p114_p1 }
   0xa   : > { %p158_p6 = scmp.lt.s32.totalorder %s675_s18, 5  ;;  %s893_s20 = smov (%p27_p3, %s891_s20), 0 }
   0xb   : > { %s99_s24 = ssub.s32 %s671_s17, %s893_s20  ;;  %s104_s26 = sadd.s32 1, %s655_s13 }
   0xc   : > { %p159_p7 = pnand %p514_p4, %p158_p6  ;;  %s101_s25 = sor.u32 %s100_s22, %s99_s24 }
   0xd   : > { %p102_p8 = scmp.eq.s32.totalorder %s101_s25, 0  ;;  %s516_s28 = sshll.u32 (!%p159_p7), %s659_s14, 4  ;;  %v768_v1 = vld [vmem:[%s878_s1] ss:$0 sm:$0xff] (!%p159_p7) }
   0xe   : > { %162 = sbr.rel (%p159_p7) target bundleno = 234 (0xea), region = 32  ;;  %p186_p9 = scmp.lt.s32.totalorder (!%p159_p7), %s663_s15, 1  ;;  %v774_v6 = vld [vmem:[%s879_s2] ss:$0 sm:$0xff] (!%p159_p7) }
   0xf   : > { %s754_s27 = scalar_select %p102_p8, %s655_s13, %s104_s26  }
  0x10   : > { %p188_p10 = scmp.lt.s32.totalorder (!%p159_p7), %s516_s28, 31  ;;  %s182_s22 = sand.u32 (!%p159_p7), 1, %s651_s12  }
  0x11   : > { %s515_s24 = sshll.u32 (!%p159_p7), %s182_s22, 7 }
  0x12   : > { %s815_s25 = scalar_lea.vmem (!%p159_p7), [#allocation2], %s515_s24 }
  0x15   : > { %s187_s29 = scalar_select %p186_p9, %s663_s15, 1 }
  0x16   : > { %s895_s28 = smov (!%p188_p10, %s516_s28), 31  ;;  %s522_s12 = sshll.u32 (%p743_p5), %s663_s15, 5 }
  0x17   : > { %s517_s30 = sshll.u32 %s187_s29, 5  ;;  %s345_s23 = sadd.s32 (%p743_p5), %s659_s14, %s522_s12 }
  0x18   : > { %s191_s4 = sadd.s32 %s517_s30, %s895_s28  ;;  %s523_s26 = sshll.u32 (%p743_p5), %s345_s23, 3 }
  0x19   : > { %s518_s5 = sshll.u32 %s191_s4, 2  ;;  %s347_s30 = scalar_lea.vmem (%p743_p5), %s880_s3, %s523_s26 }
  0x1a   : > { %s762_s8 = scalar_lea.vmem %s877_s0, %s518_s5 }
  0x1b   : > { %v527_v0 = vld [vmem:[%s762_s8] sm:$0xff]   ;;  %v558_v2 = vld [vmem:[%s762_s8 + $0x8] sm:$0xff]   ;;  %v559_v13 = vld [vmem:[%s762_s8 + $0x10] sm:$0xff]  }
  0x1c   : > { %v528_v3 = vunpack.c.l.bf16 %v527_v0  ;;  %v529_v4 = vunpack.c.h.bf16 %v527_v0  ;;  %v532_v5 = vunpack.c.l.bf16 %v558_v2  ;;  %v533_v12 = vunpack.c.h.bf16 %v558_v2  ;;  %v560_v23 = vld [vmem:[%s762_s8 + $0x18] sm:$0xff]   ;;  %v561_v32 = vld [vmem:[%s762_s8 + $0x20] sm:$0xff]   ;;  %v562_v41 = vld [vmem:[%s762_s8 + $0x28] sm:$0xff]  }
  0x1d   : > { %v536_v18 = vunpack.c.l.bf16 %v559_v13  ;;  %v537_v22 = vunpack.c.h.bf16 %v559_v13  ;;  %v540_v27 = vunpack.c.l.bf16 %v560_v23  ;;  %v541_v31 = vunpack.c.h.bf16 %v560_v23  ;;  %v563_v50 = vld [vmem:[%s762_s8 + $0x30] sm:$0xff]   ;;  %v564_v59 = vld [vmem:[%s762_s8 + $0x38] sm:$0xff]  }
  0x1e   : > { %v234_v7 = vmul.f32 %v528_v3, %v768_v1  ;;  %v235_v8 = vmul.f32 %v529_v4, %v768_v1  ;;  %v236_v11 = vmul.f32 %v532_v5, %v768_v1  ;;  %v237_v17 = vmul.f32 %v533_v12, %v768_v1 }
  0x1f   : > { %v238_v21 = vmul.f32 %v536_v18, %v768_v1  ;;  %v239_v26 = vmul.f32 %v537_v22, %v768_v1  ;;  %v240_v30 = vmul.f32 %v540_v27, %v768_v1  ;;  %v241_v35 = vmul.f32 %v541_v31, %v768_v1 }
  0x20   : > { %v257_v9 = vadd.f32 %v774_v6, %v234_v7  ;;  %v258_v10 = vadd.f32 %v774_v6, %v235_v8  ;;  %v259_v16 = vadd.f32 %v774_v6, %v236_v11  ;;  %v260_v20 = vadd.f32 %v774_v6, %v237_v17 }
  0x21   : > { %v261_v25 = vadd.f32 %v774_v6, %v238_v21  ;;  %v262_v29 = vadd.f32 %v774_v6, %v239_v26  ;;  %v263_v34 = vadd.f32 %v774_v6, %v240_v30  ;;  %v544_v36 = vunpack.c.l.bf16 %v561_v32 }
  0x22   : > { %v273_v14 = vmax.f32 %v257_v9, 0.0  ;;  %v274_v15 = vmax.f32 %v258_v10, 0.0  ;;  %v275_v19 = vmax.f32 %v259_v16, 0.0  ;;  %v276_v24 = vmax.f32 %v260_v20, 0.0 }
  0x23   : > { %v277_v28 = vmax.f32 %v261_v25, 0.0  ;;  %v278_v33 = vmax.f32 %v262_v29, 0.0  ;;  %v279_v37 = vmax.f32 %v263_v34, 0.0  ;;  %v264_v38 = vadd.f32 %v774_v6, %v241_v35 }
  0x24   : > { %289 = vxpose.xlu0.b32.start [1/16] %v273_v14, 128  ;;  %v242_v39 = vmul.f32 %v544_v36, %v768_v1  ;;  %v545_v40 = vunpack.c.h.bf16 %v561_v32  ;;  %v548_v45 = vunpack.c.l.bf16 %v562_v41  ;;  %v549_v49 = vunpack.c.h.bf16 %v562_v41 }
  0x25   : > { %v280_v42 = vmax.f32 %v264_v38, 0.0  ;;  %v552_v54 = vunpack.c.l.bf16 %v563_v50  ;;  %v553_v58 = vunpack.c.h.bf16 %v563_v50  ;;  %v556_v63 = vunpack.c.l.bf16 %v564_v59 }
  0x26   : > { %v265_v43 = vadd.f32 %v774_v6, %v242_v39  ;;  %v243_v44 = vmul.f32 %v545_v40, %v768_v1  ;;  %v244_v48 = vmul.f32 %v548_v45, %v768_v1  ;;  %v245_v53 = vmul.f32 %v549_v49, %v768_v1 }
  0x27   : > { %v246_v57 = vmul.f32 %v552_v54, %v768_v1  ;;  %v247_v62 = vmul.f32 %v553_v58, %v768_v1  ;;  %v248_v3 = vmul.f32 %v556_v63, %v768_v1  ;;  %v557_v4 = vunpack.c.h.bf16 %v564_v59 }
  0x28   : > { %290 = vxpose.xlu0.b32.cont [2/16] %v274_v15, 128  ;;  %v281_v46 = vmax.f32 %v265_v43, 0.0  ;;  %v266_v47 = vadd.f32 %v774_v6, %v243_v44  ;;  %v267_v52 = vadd.f32 %v774_v6, %v244_v48  ;;  %v268_v56 = vadd.f32 %v774_v6, %v245_v53 }
  0x29   : > { %v269_v61 = vadd.f32 %v774_v6, %v246_v57  ;;  %v270_v2 = vadd.f32 %v774_v6, %v247_v62  ;;  %v271_v7 = vadd.f32 %v774_v6, %v248_v3  ;;  %v249_v8 = vmul.f32 %v557_v4, %v768_v1 }
  0x2a   : > { %v282_v51 = vmax.f32 %v266_v47, 0.0  ;;  %v283_v55 = vmax.f32 %v267_v52, 0.0  ;;  %v284_v60 = vmax.f32 %v268_v56, 0.0 }
  0x2b   : > { %v285_v0 = vmax.f32 %v269_v61, 0.0  ;;  %v286_v5 = vmax.f32 %v270_v2, 0.0  ;;  %v287_v9 = vmax.f32 %v271_v7, 0.0  ;;  %v272_v10 = vadd.f32 %v774_v6, %v249_v8 }
  0x2c   : > { %291 = vxpose.xlu0.b32.cont [3/16] %v275_v19, 128 }
  0x2d   : > { %v288_v11 = vmax.f32 %v272_v10, 0.0 }
  0x30   : > { %292 = vxpose.xlu0.b32.cont [4/16] %v276_v24, 128 }
  0x34   : > { %293 = vxpose.xlu0.b32.cont [5/16] %v277_v28, 128 }
  0x38   : > { %294 = vxpose.xlu0.b32.cont [6/16] %v278_v33, 128 }
  0x3c   : > { %295 = vxpose.xlu0.b32.cont [7/16] %v279_v37, 128 }
  0x40   : > { %296 = vxpose.xlu0.b32.cont [8/16] %v280_v42, 128 }
  0x44   : > { %297 = vxpose.xlu0.b32.cont [9/16] %v281_v46, 128 }
  0x48   : > { %298 = vxpose.xlu0.b32.cont [10/16] %v282_v51, 128 }
  0x4c   : > { %299 = vxpose.xlu0.b32.cont [11/16] %v283_v55, 128 }
  0x50   : > { %300 = vxpose.xlu0.b32.cont [12/16] %v284_v60, 128 }
  0x54   : > { %301 = vxpose.xlu0.b32.cont [13/16] %v285_v0, 128 }
  0x58   : > { %302 = vxpose.xlu0.b32.cont [14/16] %v286_v5, 128 }
  0x5c   : > { %303 = vxpose.xlu0.b32.cont [15/16] %v287_v9, 128 }
  0x60   : > { %304 = vxpose.xlu0.b32.end [16/16] %v288_v11, 128 }
  0xa4   : > { %v305_v12 = vpop.trf.xlu0 }
  0xa5   : > { %321 = vst [vmem:[%s815_s25] sm:$0xff] %v305_v12 }
  0xa8   : > { %v306_v1 = vpop.trf.xlu0 }
  0xa9   : > { %322 = vst [vmem:[%s815_s25 + $0x8] sm:$0xff] %v306_v1 }
  0xac   : > { %v307_v6 = vpop.trf.xlu0  ;;  %v405_v26 = vld [vmem:[%s815_s25] sm:$0xff] (%p743_p5) }
  0xad   : > { %323 = vst [vmem:[%s815_s25 + $0x10] sm:$0xff] %v307_v6  ;;  %406 = vst [vmem:[%s347_s30] sm:$0xff] (%p743_p5), %v405_v26 }
  0xb0   : > { %v308_v13 = vpop.trf.xlu0  ;;  %v407_v27 = vld [vmem:[%s815_s25 + $0x8] sm:$0xff] (%p743_p5) }
  0xb1   : > { %324 = vst [vmem:[%s815_s25 + $0x18] sm:$0xff] %v308_v13  ;;  %408 = vst [vmem:[%s347_s30 + $0x10] sm:$0xff] (%p743_p5), %v407_v27 }
  0xb4   : > { %v309_v14 = vpop.trf.xlu0  ;;  %v409_v28 = vld [vmem:[%s815_s25 + $0x10] sm:$0xff] (%p743_p5) }
  0xb5   : > { %325 = vst [vmem:[%s815_s25 + $0x20] sm:$0xff] %v309_v14  ;;  %410 = vst [vmem:[%s347_s30 + $0x20] sm:$0xff] (%p743_p5), %v409_v28 }
  0xb8   : > { %v310_v15 = vpop.trf.xlu0  ;;  %v411_v29 = vld [vmem:[%s815_s25 + $0x18] sm:$0xff] (%p743_p5) }
  0xb9   : > { %326 = vst [vmem:[%s815_s25 + $0x28] sm:$0xff] %v310_v15  ;;  %412 = vst [vmem:[%s347_s30 + $0x30] sm:$0xff] (%p743_p5), %v411_v29 }
  0xbc   : > { %v311_v16 = vpop.trf.xlu0  ;;  %v413_v30 = vld [vmem:[%s815_s25 + $0x20] sm:$0xff] (%p743_p5) }
  0xbd   : > { %327 = vst [vmem:[%s815_s25 + $0x30] sm:$0xff] %v311_v16  ;;  %414 = vst [vmem:[%s347_s30 + $0x40] sm:$0xff] (%p743_p5), %v413_v30 }
  0xc0   : > { %v312_v17 = vpop.trf.xlu0  ;;  %v415_v31 = vld [vmem:[%s815_s25 + $0x28] sm:$0xff] (%p743_p5) }
  0xc1   : > { %328 = vst [vmem:[%s815_s25 + $0x38] sm:$0xff] %v312_v17  ;;  %416 = vst [vmem:[%s347_s30 + $0x50] sm:$0xff] (%p743_p5), %v415_v31 }
  0xc4   : > { %v313_v18 = vpop.trf.xlu0  ;;  %v417_v32 = vld [vmem:[%s815_s25 + $0x30] sm:$0xff] (%p743_p5) }
  0xc5   : > { %329 = vst [vmem:[%s815_s25 + $0x40] sm:$0xff] %v313_v18  ;;  %418 = vst [vmem:[%s347_s30 + $0x60] sm:$0xff] (%p743_p5), %v417_v32 }
  0xc8   : > { %v314_v19 = vpop.trf.xlu0  ;;  %v419_v33 = vld [vmem:[%s815_s25 + $0x38] sm:$0xff] (%p743_p5) }
  0xc9   : > { %330 = vst [vmem:[%s815_s25 + $0x48] sm:$0xff] %v314_v19  ;;  %420 = vst [vmem:[%s347_s30 + $0x70] sm:$0xff] (%p743_p5), %v419_v33 }
  0xcc   : > { %v315_v20 = vpop.trf.xlu0  ;;  %v421_v34 = vld [vmem:[%s815_s25 + $0x40] sm:$0xff] (%p743_p5) }
  0xcd   : > { %331 = vst [vmem:[%s815_s25 + $0x50] sm:$0xff] %v315_v20  ;;  %422 = vst [vmem:[%s347_s30 + $0x80] sm:$0xff] (%p743_p5), %v421_v34 }
  0xd0   : > { %v316_v21 = vpop.trf.xlu0  ;;  %v423_v35 = vld [vmem:[%s815_s25 + $0x48] sm:$0xff] (%p743_p5) }
  0xd1   : > { %332 = vst [vmem:[%s815_s25 + $0x58] sm:$0xff] %v316_v21  ;;  %424 = vst [vmem:[%s347_s30 + $0x90] sm:$0xff] (%p743_p5), %v423_v35 }
  0xd4   : > { %v317_v22 = vpop.trf.xlu0  ;;  %v425_v36 = vld [vmem:[%s815_s25 + $0x50] sm:$0xff] (%p743_p5) }
  0xd5   : > { %333 = vst [vmem:[%s815_s25 + $0x60] sm:$0xff] %v317_v22  ;;  %426 = vst [vmem:[%s347_s30 + $0xa0] sm:$0xff] (%p743_p5), %v425_v36 }
  0xd8   : > { %v318_v23 = vpop.trf.xlu0  ;;  %v427_v37 = vld [vmem:[%s815_s25 + $0x58] sm:$0xff] (%p743_p5) }
  0xd9   : > { %334 = vst [vmem:[%s815_s25 + $0x68] sm:$0xff] %v318_v23  ;;  %428 = vst [vmem:[%s347_s30 + $0xb0] sm:$0xff] (%p743_p5), %v427_v37 }
  0xdb   : > { %343 = sbr.rel (!%p743_p5) target bundleno = 234 (0xea), region = 36 }
  0xdc   : > { %v319_v24 = vpop.trf.xlu0  ;;  %v429_v38 = vld [vmem:[%s815_s25 + $0x60] sm:$0xff] (%p743_p5) }
  0xdd   : > { %335 = vst [vmem:[%s815_s25 + $0x70] sm:$0xff] %v319_v24  ;;  %430 = vst [vmem:[%s347_s30 + $0xc0] sm:$0xff] (%p743_p5), %v429_v38 }
  0xe0   : > { %v320_v25 = vpop.trf.xlu0  ;;  %v431_v39 = vld [vmem:[%s815_s25 + $0x68] sm:$0xff] (%p743_p5) }
  0xe1   : > { %336 = vst [vmem:[%s815_s25 + $0x78] sm:$0xff] %v320_v25  ;;  %432 = vst [vmem:[%s347_s30 + $0xd0] sm:$0xff] (%p743_p5), %v431_v39 }
  0xe4   : > { %v433_v40 = vld [vmem:[%s815_s25 + $0x70] sm:$0xff] }
  0xe5   : > { %434 = vst [vmem:[%s347_s30 + $0xe0] sm:$0xff] %v433_v40 }
  0xe8   : > { %v435_v41 = vld [vmem:[%s815_s25 + $0x78] sm:$0xff] }
  0xe9   : > { %436 = vst [vmem:[%s347_s30 + $0xf0] sm:$0xff] %v435_v41 }
  0xea PF: > { %s13_s18 = sadd.s32 1, %s675_s18   ;;  %s882_s12 = smov %s655_s13 }
  0xeb   : > { %p10_p11 = scmp.ge.s32.totalorder %s13_s18, 6   ;;  %s883_s13 = smov %s754_s27 }
  0xec   : > { %s884_s14 = smov %s667_s16  ;;  %s885_s15 = smov %s671_s17 }
  0xed   : > { %s886_s16 = smov %s889_s19  ;;  %s887_s17 = smov %s893_s20 }
  0xee   :  { %12 = sbr.rel (!%p10_p11) target bundleno = 4 (0x4), region = 100 }

// kernel: cbr2d.2
= control target key start
LH: loop header
LB: loop body
LE: loop exit
PB: predicated region body
PF: predicated region fallthrough
CT: control target
= control target key end

     0   :  { %s3839_s12 = smov 0   ;;  %s3841_s13 = smov 0   ;;  %s4774_s0 = inlined_call_operand.vmem [shape: bf16[2,2,10,18,4], index: 0, kind: input, shape index: {}]   ;;  %s4775_s1 = inlined_call_operand.vmem [shape: bf16[9,4,128], index: 1, kind: input, shape index: {}]   ;;  %s4776_s2 = inlined_call_operand.vmem [shape: bf16[2,256,128], index: 2, kind: output, shape index: {0}]   ;;  %s4777_s3 = inlined_call_operand.vmem [shape: f32[2,2,2,128], index: 3, kind: output, shape index: {1}]  }
   0x1   :  { %s3843_s14 = smov 0   ;;  %s3845_s15 = smov 0  }
   0x2   :  { %s3847_s16 = smov 0  }
   0x3 LB: > { %s23_s17 = sadd.s32 1, %s3809_s14  ;;  %s26_s18 = sadd.s32 1, %s3813_s15  ;;  %s3817_s16 = sphi %s3847_s16, %s14_s16   ;;  %s3813_s15 = sphi %s3845_s15, %s4803_s15   ;;  %s3809_s14 = sphi %s3843_s14, %s4802_s14   ;;  %s3805_s13 = sphi %s3841_s13, %s4801_s13   ;;  %s3801_s12 = sphi %s3839_s12, %s4800_s12  }
   0x4   : > { %p24_p0 = scmp.ge.s32.totalorder %s23_s17, 2  ;;  %p2969_p1 = scmp.ge.s32.totalorder %s3817_s16, 1 }
   0x5   : > { %p162_p2 = scmp.lt.s32.totalorder %s3817_s16, 5 }
   0x6   : > { %s4805_s17 = smov (%p24_p0, %s23_s17), 0  ;;  %s4807_s18 = smov (!%p24_p0, %s26_s18), %s3813_s15 }
   0x7   : > { %p163_p3 = pnand %p2969_p1, %p162_p2  ;;  %p28_p4 = scmp.ge.s32.totalorder %s4807_s18, 2 }
   0x9   : > { %s4809_s18 = smov (%p28_p4, %s4807_s18), 0  ;;  %166 = sbr.rel (%p163_p3) target bundleno = 440 (0x1b8), region = 28 }
  0x10   : > { %v2976_v0 = vld [vmem:[%s4775_s1 + $0x2] sm:$0x3]  ;;  %vm501_vm0 = vcmask 1041408   ;;  %v3091_v1 = vld [vmem:[%s4775_s1 + $0x8] sm:$0x3]  ;;  %p202_p5 = scmp.lt.s32.totalorder %s3805_s13, 1 }
  0x11   : > { %3702 = vmatprep.subr.msk.bf16.mxu1 %vm501_vm0, %v2976_v0  ;;  %3706 = vmatprep.subr.msk.bf16.mxu0 %vm501_vm0, %v3091_v1  ;;  %v503_v2 = vsel %vm501_vm0, %v2976_v0, 0  ;;  %v3881_v3 = vsel %vm501_vm0, %v3091_v1, 0  ;;  %p204_p6 = scmp.lt.s32.totalorder %s3801_s12, 1  ;;  %v246_v4 = vld [vmem:[%s4775_s1] sm:$0x3]  ;;  %vm476_vm3 = vcmask 31744  }
  0x12   : > { %3411 = vmatpush3.bf16.msra.mxu1 %v503_v2  ;;  %3483 = vmatpush3.bf16.msra.mxu0 %v3881_v3  ;;  %s4811_s13 = smov (!%p202_p5, %s3805_s13), 1  ;;  %v3124_v5 = vld [vmem:[%s4775_s1 + $0xa] sm:$0x3]  ;;  %vm255_vm1 = vsmask.f32 3328  ;;  %v3927_v17 = vsel %vm501_vm0, %v246_v4, 0 }
  0x13   : > { %s3891_s25 = scalar_select %p204_p6, %s3801_s12, 1  ;;  %3703 = vmatprep.subr.msk.bf16.mxu1 %vm501_vm0, %v246_v4  ;;  %3708 = vmatprep.subr.msk.bf16.mxu0 %vm501_vm0, %v3124_v5  ;;  %vm256_vm2 = vsmask.f32 7440  ;;  %v3933_v26 = vld [vmem:[%s4775_s1 + $0xc] sm:$0x3]  ;;  %v3950_v37 = vsel %vm501_vm0, %v3124_v5, 0 }
  0x14   : > { %s3713_s28 = smul.u32 60, %s4811_s13  ;;  %vm3942_vm4 = vmor %vm255_vm1, %vm256_vm2  ;;  %v3954_v41 = vsel %vm501_vm0, %v3933_v26, 0  ;;  %vm790_vm5 = vcmask 1042432   ;;  %vm791_vm6 = vcmask 1046532  }
  0x15   : > { %s3712_s29 = smul.u32 30, %s3891_s25  ;;  %vm4097_vm7 = vmor %vm790_vm5, %vm791_vm6 }
  0x17   : > { %s208_s30 = sadd.s32 %s3713_s28, %s3712_s29  ;;  %s2971_s28 = sshll.u32 %s3801_s12, 4 }
  0x18   : > { %s2970_s4 = sshll.u32 %s208_s30, 2  ;;  %p214_p7 = scmp.lt.s32.totalorder %s2971_s28, 31 }
  0x19   : > { %s3903_s7 = scalar_lea.vmem %s4774_s0, %s2970_s4  ;;  %s2972_s29 = sshll.u32 %s4811_s13, 5 }
  0x1a   : > { %v3906_v6 = vld [vmem:[%s3903_s7] sm:$0xf]  ;;  %v3909_v7 = vld [vmem:[%s3903_s7 + $0x4] sm:$0xf]  ;;  %v3912_v8 = vld [vmem:[%s3903_s7 + $0x8] sm:$0x1] }
  0x1b   : > { %v259_v9 = vshrl.u32 %v3906_v6, 16  ;;  %v262_v10 = vshll.u32 %v3906_v6, 16  ;;  %v268_v11 = vshll.u32 %v3909_v7, 16  ;;  %v272_v12 = vshrl.u32 %v3909_v7, 16  ;;  %v3067_v13 = vld [vmem:[%s3903_s7 + $0xc] sm:$0xf] }
  0x1c   : > { %v278_v14 = vshll.u32 %v3912_v8, 16  ;;  %v3921_v15 = vld [vmem:[%s3903_s7 + $0x10] sm:$0xf]  ;;  %v3924_v16 = vld [vmem:[%s3903_s7 + $0x14] sm:$0x1]  ;;  %v1239_v23 = vshrl.u32 %v3067_v13, 16 }
  0x1d   : > { %v261_v18 = vrot.slane %v259_v9, 4  ;;  %v264_v19 = vrot.slane %v262_v10, 5  ;;  %v270_v20 = vrot.slane %v268_v11, 5  ;;  %v274_v21 = vrot.slane %v272_v12, 4  ;;  %v3938_v31 = vld [vmem:[%s3903_s7 + $0xc] sm:$0xf] }
  0x1e   : > { %v280_v22 = vrot.slane %v278_v14, 5  ;;  %v1242_v24 = vshll.u32 %v3067_v13, 16  ;;  %v1248_v25 = vshll.u32 %v3921_v15, 16  ;;  %v1252_v29 = vshrl.u32 %v3921_v15, 16  ;;  %v3947_v36 = vld [vmem:[%s3903_s7 + $0x10] sm:$0xf] }
  0x1f   : > { %v265_v27 = vor.u32 %v264_v19, %v261_v18  ;;  %v275_v28 = vor.u32 %v274_v21, %v270_v20  ;;  %v1258_v30 = vshll.u32 %v3924_v16, 16  ;;  %v1241_v33 = vrot.slane %v1239_v23, 4  ;;  %v3957_v44 = vld [vmem:[%s3903_s7 + $0x14] sm:$0x1]  ;;  %v3070_v55 = vld [vmem:[%s3903_s7 + $0x18] sm:$0xf] }
  0x20   : > { %v1244_v34 = vrot.slane %v1242_v24, 5  ;;  %v1250_v35 = vrot.slane %v1248_v25, 5  ;;  %v1254_v40 = vrot.slane %v1252_v29, 4  ;;  %v283_v45 = vshrl.u32 %v3938_v31, 16  ;;  %v3970_v60 = vld [vmem:[%s3903_s7 + $0x1c] sm:$0xf] }
  0x21   : > { %v266_v38 = vrot.slane %v265_v27, 4  ;;  %v276_v39 = vrot.slane %v275_v28, 4  ;;  %v1260_v43 = vrot.slane %v1258_v30, 5  ;;  %v286_v46 = vshll.u32 %v3938_v31, 16  ;;  %v3978_v1 = vld [vmem:[%s3903_s7 + $0x20] sm:$0x1] }
  0x22   : > { %v1245_v42 = vor.u32 %v1244_v34, %v1241_v33  ;;  %v1255_v49 = vor.u32 %v1254_v40, %v1250_v35  ;;  %v292_v50 = vshll.u32 %v3947_v36, 16  ;;  %v285_v53 = vrot.slane %v283_v45, 4  ;;  %v3986_v21 = vld [vmem:[%s3903_s7 + $0x18] sm:$0xf]  ;;  %v3993_v27 = vld [vmem:[%s3903_s7 + $0x1c] sm:$0xf] }
  0x23   : > { %v271_v47 = vsel %vm3942_vm4, %v266_v38, %v270_v20  ;;  %v281_v48 = vsel %vm3942_vm4, %v276_v39, %v280_v22  ;;  %v288_v54 = vrot.slane %v286_v46, 5  ;;  %v296_v58 = vshrl.u32 %v3947_v36, 16  ;;  %v4001_v38 = vld [vmem:[%s3903_s7 + $0x20] sm:$0x1]  ;;  %s4813_s28 = smov (!%p214_p7, %s2971_s28), 31 }
  0x24   : > { %v2977_v51 = vcombine.low %v271_v47, %v281_v48  ;;  %v1246_v52 = vrot.slane %v1245_v42, 4  ;;  %v1256_v56 = vrot.slane %v1255_v49, 4  ;;  %v294_v57 = vrot.slane %v292_v50, 5  ;;  %v3073_v47 = vld [vmem:[%s3903_s7 + $0x24] sm:$0xf]  ;;  %s217_s30 = sadd.s32 %s2972_s29, %s4813_s28 }
  0x25   : > { %v302_v59 = vshll.u32 %v3957_v44, 16  ;;  %v1630_v62 = vrot.slane %v3921_v15, 5  ;;  %v1633_v63 = vrot.slane %v3924_v16, 5  ;;  %v289_v0 = vor.u32 %v288_v54, %v285_v53  ;;  %s2973_s4 = sshll.u32 %s217_s30, 2 }
  0x26   : > { %3412 = vmatprep.mubr.msk.bf16.mxu1 %vm476_vm3, %v2977_v51  ;;  %v1251_v61 = vsel %vm3942_vm4, %v1246_v52, %v1250_v35  ;;  %v1261_v2 = vsel %vm3942_vm4, %v1256_v56, %v1260_v43  ;;  %v298_v4 = vrot.slane %v296_v58, 4  ;;  %v1263_v9 = vshrl.u32 %v3070_v55, 16  ;;  %v4011_v52 = vld [vmem:[%s3903_s7 + $0x28] sm:$0xf]  ;;  %s4744_s12 = scalar_lea.vmem %s4776_s2, %s2973_s4 }
  0x27   : > { %v304_v5 = vrot.slane %v302_v59, 5  ;;  %v3092_v10 = vcombine.low %v1251_v61, %v1261_v2  ;;  %v290_v11 = vrot.slane %v289_v0, 4  ;;  %v1266_v12 = vshll.u32 %v3070_v55, 16  ;;  %v4023_v61 = vld [vmem:[%s3903_s7 + $0x2c] sm:$0x1] }
  0x28   : > { %v1272_v13 = vshll.u32 %v3970_v60, 16  ;;  %v299_v14 = vor.u32 %v298_v4, %v294_v57  ;;  %v1265_v18 = vrot.slane %v1263_v9, 4  ;;  %v1276_v19 = vshrl.u32 %v3970_v60, 16 }
  0x29   : > { %v1282_v20 = vshll.u32 %v3978_v1, 16  ;;  %3484 = vmatprep.mubr.msk.bf16.mxu0 %vm476_vm3, %v3092_v10  ;;  %v295_v22 = vsel %vm3942_vm4, %v290_v11, %v294_v57  ;;  %v1268_v23 = vrot.slane %v1266_v12, 5  ;;  %v1637_v25 = vrot.slane %v3970_v60, 5  ;;  %v4017_v57 = vld [vmem:[%s4775_s1 + $0x4] sm:$0x3] }
  0x2a   : > { %v1274_v24 = vrot.slane %v1272_v13, 5  ;;  %v300_v28 = vrot.slane %v299_v14, 4  ;;  %v1278_v29 = vrot.slane %v1276_v19, 4  ;;  %v1640_v33 = vrot.slane %v3978_v1, 5  ;;  %v4030_v11 = vld [vmem:[%s3903_s7 + $0x24] sm:$0xf] }
  0x2b   : > { %v1284_v30 = vrot.slane %v1282_v20, 5  ;;  %v1269_v34 = vor.u32 %v1268_v23, %v1265_v18  ;;  %v3998_v35 = vrot.slane %v1637_v25, 4  ;;  %v307_v39 = vshrl.u32 %v3986_v21, 16  ;;  %v4033_v19 = vld [vmem:[%s3903_s7 + $0x28] sm:$0xf] }
  0x2c   : > { %v310_v40 = vshll.u32 %v3986_v21, 16  ;;  %v305_v42 = vsel %vm3942_vm4, %v300_v28, %v304_v5  ;;  %v1279_v43 = vor.u32 %v1278_v29, %v1274_v24  ;;  %v316_v45 = vshll.u32 %v3993_v27, 16  ;;  %v4043_v29 = vld [vmem:[%s3903_s7 + $0x2c] sm:$0x1] }
  0x2d   : > { %v320_v46 = vshrl.u32 %v3993_v27, 16  ;;  %v2978_v48 = vcombine.low %v295_v22, %v305_v42  ;;  %v1270_v49 = vrot.slane %v1269_v34, 4  ;;  %v309_v50 = vrot.slane %v307_v39, 4 }
  0x2e   : > { %v312_v51 = vrot.slane %v310_v40, 5  ;;  %v1280_v53 = vrot.slane %v1279_v43, 4  ;;  %v318_v54 = vrot.slane %v316_v45, 5  ;;  %v326_v56 = vshll.u32 %v4001_v38, 16  ;;  %v3076_v45 = vld [vmem:[%s3903_s7 + $0x30] sm:$0xf] }
  0x2f   : > { %v322_v55 = vrot.slane %v320_v46, 4  ;;  %3413 = vmatmul.mubr.msk.bf16.vlgmr.msra.gmra.mrb[0].mxu1 %vm476_vm3, %v2978_v48  ;;  %v1275_v58 = vsel %vm3942_vm4, %v1270_v49, %v1274_v24  ;;  %v1287_v0 = vshrl.u32 %v3073_v47, 16  ;;  %v1290_v2 = vshll.u32 %v3073_v47, 16 }
  0x30   : > { %v313_v59 = vor.u32 %v312_v51, %v309_v50  ;;  %3429 = vmatpush3.bf16.msra.mxu1 %v3927_v17  ;;  %v1285_v4 = vsel %vm3942_vm4, %v1280_v53, %v1284_v30  ;;  %v328_v9 = vrot.slane %v326_v56, 5  ;;  %v1296_v10 = vshll.u32 %v4011_v52, 16  ;;  %v4053_v50 = vld [vmem:[%s3903_s7 + $0x34] sm:$0xf] }
  0x31   : > { %v323_v5 = vor.u32 %v322_v55, %v318_v54  ;;  %v3093_v12 = vcombine.low %v1275_v58, %v1285_v4  ;;  %v1289_v14 = vrot.slane %v1287_v0, 4  ;;  %v1292_v18 = vrot.slane %v1290_v2, 5  ;;  %3704 = vmatprep.subr.msk.bf16.mxu1 %vm501_vm0, %v4017_v57  ;;  %v4063_v58 = vld [vmem:[%s3903_s7 + $0x38] sm:$0x1] }
  0x32   : > { %v314_v13 = vrot.slane %v313_v59, 4  ;;  %v1298_v20 = vrot.slane %v1296_v10, 5  ;;  %v1300_v22 = vshrl.u32 %v4011_v52, 16  ;;  %v1306_v23 = vshll.u32 %v4023_v61, 16 }
  0x33   : > { %v324_v17 = vrot.slane %v323_v5, 4  ;;  %3485 = vmatmul.mubr.msk.bf16.vlgmr.msra.gmra.mrb[0].mxu0 %vm476_vm3, %v3093_v12  ;;  %v1293_v28 = vor.u32 %v1292_v18, %v1289_v14  ;;  %v331_v30 = vshrl.u32 %v4030_v11, 16  ;;  %v334_v34 = vshll.u32 %v4030_v11, 16  ;;  %v4068_v14 = vld [vmem:[%s3903_s7 + $0x30] sm:$0xf] }
  0x34   : > { %v319_v24 = vsel %vm3942_vm4, %v314_v13, %v318_v54  ;;  %3501 = vmatpush3.bf16.msra.mxu0 %v3950_v37  ;;  %v1302_v40 = vrot.slane %v1300_v22, 4  ;;  %v1308_v42 = vrot.slane %v1306_v23, 5  ;;  %v340_v43 = vshll.u32 %v4033_v19, 16  ;;  %v4074_v23 = vld [vmem:[%s3903_s7 + $0x34] sm:$0xf] }
  0x35   : > { %v329_v39 = vsel %vm3942_vm4, %v324_v17, %v328_v9  ;;  %v1294_v47 = vrot.slane %v1293_v28, 4  ;;  %v333_v48 = vrot.slane %v331_v30, 4  ;;  %v336_v49 = vrot.slane %v334_v34, 5  ;;  %3709 = vmatprep.subr.msk.bf16.mxu0 %vm501_vm0, %v3933_v26 }
  0x36   : > { %v2979_v46 = vcombine.low %v319_v24, %v329_v39  ;;  %v1303_v37 = vor.u32 %v1302_v40, %v1298_v20  ;;  %v342_v51 = vrot.slane %v340_v43, 5  ;;  %v344_v53 = vshrl.u32 %v4033_v19, 16  ;;  %v4079_v39 = vld [vmem:[%s3903_s7 + $0x38] sm:$0x1] }
  0x37   : > { %v350_v54 = vshll.u32 %v4043_v29, 16  ;;  %v1299_v55 = vsel %vm3942_vm4, %v1294_v47, %v1298_v20  ;;  %v337_v56 = vor.u32 %v336_v49, %v333_v48  ;;  %v1311_v59 = vshrl.u32 %v3076_v45, 16 }
  0x38   : > { %3416 = vmatprep.mubr.msk.bf16.mxu1 %vm476_vm3, %v2979_v46  ;;  %v1314_v0 = vshll.u32 %v3076_v45, 16  ;;  %v1304_v2 = vrot.slane %v1303_v37, 4  ;;  %v346_v26 = vrot.slane %v344_v53, 4  ;;  %v1320_v5 = vshll.u32 %v4053_v50, 16  ;;  %v3108_v37 = vld [vmem:[%s3903_s7 + $0xc] sm:$0xe] }
  0x39   : > { %v352_v4 = vrot.slane %v350_v54, 5  ;;  %v338_v9 = vrot.slane %v337_v56, 4  ;;  %v1313_v10 = vrot.slane %v1311_v59, 4  ;;  %v1324_v13 = vshrl.u32 %v4053_v50, 16  ;;  %v4091_v56 = vld [vmem:[%s3903_s7 + $0x3c] sm:$0xf] }
  0x3a   : > { %v1316_v12 = vrot.slane %v1314_v0, 5  ;;  %v1309_v18 = vsel %vm3942_vm4, %v1304_v2, %v1308_v42  ;;  %v347_v17 = vor.u32 %v346_v26, %v342_v51  ;;  %v1322_v20 = vrot.slane %v1320_v5, 5 }
  0x3b   : > { %v1330_v22 = vshll.u32 %v4063_v58, 16  ;;  %v3094_v24 = vcombine.low %v1299_v55, %v1309_v18  ;;  %v343_v28 = vsel %vm3942_vm4, %v338_v9, %v342_v51  ;;  %v1326_v34 = vrot.slane %v1324_v13, 4  ;;  %v4105_v18 = vld [vmem:[%s3903_s7 + $0x44] sm:$0x1] }
  0x3c   : > { %v1317_v30 = vor.u32 %v1316_v12, %v1313_v10  ;;  %v348_v40 = vrot.slane %v347_v17, 4  ;;  %v355_v42 = vshrl.u32 %v4068_v14, 16  ;;  %v358_v45 = vshll.u32 %v4068_v14, 16  ;;  %v3109_v17 = vld [vmem:[%s3903_s7 + $0x18] sm:$0xe] }
  0x3d   : > { %v1332_v43 = vrot.slane %v1330_v22, 5  ;;  %3488 = vmatprep.mubr.msk.bf16.mxu0 %vm476_vm3, %v3094_v24  ;;  %v1327_v47 = vor.u32 %v1326_v34, %v1322_v20  ;;  %v364_v48 = vshll.u32 %v4074_v23, 16  ;;  %v368_v49 = vshrl.u32 %v4074_v23, 16 }
  0x3e   : > { %v1318_v46 = vrot.slane %v1317_v30, 4  ;;  %v353_v51 = vsel %vm3942_vm4, %v348_v40, %v352_v4  ;;  %v357_v53 = vrot.slane %v355_v42, 4  ;;  %v360_v54 = vrot.slane %v358_v45, 5  ;;  %v4102_v4 = vld [vmem:[%s3903_s7 + $0x40] sm:$0xf] }
  0x3f   : > { %v374_v55 = vshll.u32 %v4079_v39, 16  ;;  %v2980_v59 = vcombine.low %v343_v28, %v353_v51  ;;  %v1328_v2 = vrot.slane %v1327_v47, 4  ;;  %v366_v26 = vrot.slane %v364_v48, 5  ;;  %v4116_v30 = vld [vmem:[%s3903_s7 + $0x48] sm:$0xf] }
  0x40   : > { %v1323_v0 = vsel %vm3942_vm4, %v1318_v46, %v1322_v20  ;;  %v361_v9 = vor.u32 %v360_v54, %v357_v53  ;;  %v370_v10 = vrot.slane %v368_v49, 4  ;;  %v3116_v13 = vrot.slane %v3108_v37, 9 }
  0x41   : > { %v376_v12 = vrot.slane %v374_v55, 5  ;;  %3417 = vmatmul.mubr.msk.bf16.gmra.mrb[4].mxu1 %vm476_vm3, %v2980_v59  ;;  %v1333_v20 = vsel %vm3942_vm4, %v1328_v2, %v1332_v43  ;;  %v1632_v22 = vrot.slane %v1630_v62, 4  ;;  %v379_v24 = vshrl.u32 %v4091_v56, 16  ;;  %v4136_v55 = vld [vmem:[%s3903_s7 + $0x50] sm:$0x1] }
  0x42   : > { %v382_v28 = vshll.u32 %v4091_v56, 16  ;;  %v3095_v34 = vcombine.low %v1323_v0, %v1333_v20  ;;  %v362_v40 = vrot.slane %v361_v9, 4  ;;  %v371_v42 = vor.u32 %v370_v10, %v366_v26 }
  0x43   : > { %v1631_v45 = vsel %vm4097_vm7, %v3116_v13, %v1630_v62  ;;  %v1634_v43 = vsel %vm4097_vm7, %v1632_v22, %v1633_v63  ;;  %v381_v46 = vrot.slane %v379_v24, 4  ;;  %v388_v48 = vshll.u32 %v4102_v4, 16  ;;  %v4132_v62 = vld [vmem:[%s3903_s7 + $0x4c] sm:$0xf] }
  0x44   : > { %v384_v47 = vrot.slane %v382_v28, 5  ;;  %3489 = vmatmul.mubr.msk.bf16.gmra.mrb[4].mxu0 %vm476_vm3, %v3095_v34  ;;  %v367_v49 = vsel %vm3942_vm4, %v362_v40, %v366_v26  ;;  %v372_v37 = vrot.slane %v371_v42, 4  ;;  %v3125_v15 = vcombine.low %v1631_v45, %v1634_v43  ;;  %v4154_v28 = vld [vmem:[%s3903_s7 + $0x54] sm:$0xf]  ;;  %v4165_v34 = vld [vmem:[%s4775_s1 + $0xe] sm:$0x3] }
  0x45   : > { %v392_v51 = vshrl.u32 %v4102_v4, 16  ;;  %v390_v53 = vrot.slane %v388_v48, 5  ;;  %v398_v63 = vshll.u32 %v4105_v18, 16  ;;  %v3117_v54 = vrot.slane %v3109_v17, 9 }
  0x46   : > { %v385_v16 = vor.u32 %v384_v47, %v381_v46  ;;  %v377_v59 = vsel %vm3942_vm4, %v372_v37, %v376_v12  ;;  %3502 = vmatprep.mubr.msk.bf16.mxu0 %vm476_vm3, %v3125_v15  ;;  %v1641_v2 = vsel %vm4097_vm7, %v3998_v35, %v1640_v33  ;;  %v403_v26 = vshrl.u32 %v4116_v30, 16  ;;  %v3110_v12 = vld [vmem:[%s3903_s7 + $0x24] sm:$0xe]  ;;  %v4170_v37 = vld [vmem:[%s3903_s7 + $0x58] sm:$0xf] }
  0x47   : > { %v394_v0 = vrot.slane %v392_v51, 4  ;;  %v2981_v9 = vcombine.low %v367_v49, %v377_v59  ;;  %v400_v13 = vrot.slane %v398_v63, 5  ;;  %v1638_v17 = vsel %vm4097_vm7, %v3117_v54, %v1637_v25  ;;  %v4179_v54 = vld [vmem:[%s3903_s7 + $0x5c] sm:$0x1] }
  0x48   : > { %v386_v10 = vrot.slane %v385_v16, 4  ;;  %v3126_v22 = vcombine.low %v1638_v17, %v1641_v2  ;;  %v405_v24 = vrot.slane %v403_v26, 4  ;;  %v406_v1 = vshll.u32 %v4116_v30, 16 }
  0x49   : > { %v395_v20 = vor.u32 %v394_v0, %v390_v53  ;;  %3420 = vmatprep.mubr.msk.bf16.mxu1 %vm476_vm3, %v2981_v9  ;;  %v412_v35 = vshll.u32 %v4132_v62, 16  ;;  %v416_v60 = vshrl.u32 %v4132_v62, 16  ;;  %v422_v25 = vshll.u32 %v4136_v55, 16 }
  0x4a   : > { %v391_v33 = vsel %vm3942_vm4, %v386_v10, %v390_v53  ;;  %v408_v42 = vrot.slane %v406_v1, 5  ;;  %v3118_v45 = vrot.slane %v3110_v12, 9  ;;  %v1644_v43 = vrot.slane %v4011_v52, 5  ;;  %v3111_v10 = vld [vmem:[%s3903_s7 + $0x30] sm:$0xe] }
  0x4b   : > { %v396_v40 = vrot.slane %v395_v20, 4  ;;  %v414_v46 = vrot.slane %v412_v35, 5  ;;  %v418_v47 = vrot.slane %v416_v60, 4  ;;  %v424_v48 = vrot.slane %v422_v25, 5 }
  0x4c   : > { %v1647_v49 = vrot.slane %v4023_v61, 5  ;;  %3503 = vmatmul.mubr.msk.bf16.vlgmr.msra.gmra.mrb[0].mxu0 %vm476_vm3, %v3126_v22  ;;  %v409_v51 = vor.u32 %v408_v42, %v405_v24  ;;  %v1645_v16 = vsel %vm4097_vm7, %v3118_v45, %v1644_v43  ;;  %v1646_v53 = vrot.slane %v1644_v43, 4  ;;  %v4200_v42 = vld [vmem:[%s3903_s7 + $0x40] sm:$0xf]  ;;  %v4203_v45 = vld [vmem:[%s3903_s7 + $0x44] sm:$0x1] }
  0x4d   : > { %v401_v15 = vsel %vm3942_vm4, %v396_v40, %v400_v13  ;;  %3519 = vmatpush3.bf16.msra.mxu0 %v3954_v41  ;;  %v419_v52 = vor.u32 %v418_v47, %v414_v46  ;;  %v427_v61 = vshrl.u32 %v4154_v28, 16  ;;  %v430_v59 = vshll.u32 %v4154_v28, 16 }
  0x4e   : > { %v2982_v63 = vcombine.low %v391_v33, %v401_v15  ;;  %v410_v0 = vrot.slane %v409_v51, 4  ;;  %v1648_v2 = vsel %vm4097_vm7, %v1646_v53, %v1647_v49  ;;  %v436_v26 = vshll.u32 %v4170_v37, 16  ;;  %3710 = vmatprep.subr.msk.bf16.mxu0 %vm501_vm0, %v4165_v34  ;;  %v3112_v33 = vld [vmem:[%s3903_s7 + $0x3c] sm:$0xe] }
  0x4f   : > { %v440_v9 = vshrl.u32 %v4170_v37, 16  ;;  %v420_v41 = vrot.slane %v419_v52, 4  ;;  %v3127_v13 = vcombine.low %v1645_v16, %v1648_v2  ;;  %v429_v17 = vrot.slane %v427_v61, 4  ;;  %v3113_v2 = vld [vmem:[%s3903_s7 + $0x48] sm:$0xe] }
  0x50   : > { %3421 = vmatmul.mubr.msk.bf16.gmra.mrb[8].mxu1 %vm476_vm3, %v2982_v63  ;;  %v432_v12 = vrot.slane %v430_v59, 5  ;;  %v415_v20 = vsel %vm3942_vm4, %v410_v0, %v414_v46  ;;  %v438_v22 = vrot.slane %v436_v26, 5  ;;  %v446_v1 = vshll.u32 %v4179_v54, 16  ;;  %v4218_v59 = vld [vmem:[%s3903_s7 + $0x4c] sm:$0xf] }
  0x51   : > { %v442_v24 = vrot.slane %v440_v9, 4  ;;  %v425_v35 = vsel %vm3942_vm4, %v420_v41, %v424_v48  ;;  %3506 = vmatprep.mubr.msk.bf16.mxu0 %vm476_vm3, %v3127_v13  ;;  %v3119_v25 = vrot.slane %v3111_v10, 9  ;;  %v1651_v40 = vrot.slane %v4053_v50, 5  ;;  %v4221_v0 = vld [vmem:[%s3903_s7 + $0x50] sm:$0x1] }
  0x52   : > { %v433_v60 = vor.u32 %v432_v12, %v429_v17  ;;  %v2983_v43 = vcombine.low %v415_v20, %v425_v35  ;;  %v448_v47 = vrot.slane %v446_v1, 5  ;;  %v1654_v49 = vrot.slane %v4063_v58, 5  ;;  %v4229_v17 = vld [vmem:[%s3903_s7 + $0x58] sm:$0xf]  ;;  %v4232_v12 = vld [vmem:[%s3903_s7 + $0x5c] sm:$0x1] }
  0x53   : > { %v443_v46 = vor.u32 %v442_v24, %v438_v22  ;;  %v1652_v48 = vsel %vm4097_vm7, %v3119_v25, %v1651_v40  ;;  %v1653_v51 = vrot.slane %v1651_v40, 4  ;;  %v3120_v16 = vrot.slane %v3112_v33, 9  ;;  %4787 = vst [vmem:[#allocation2_spill] sm:$0xff] %v4232_v12  ;;  %v4242_v35 = vld [vmem:[%s3903_s7 + $0x64] sm:$0xf] }
  0x54   : > { %v434_v15 = vrot.slane %v433_v60, 4  ;;  %3424 = vmatprep.mubr.msk.bf16.mxu1 %vm476_vm3, %v2983_v43  ;;  %v1658_v53 = vrot.slane %v4200_v42, 5  ;;  %v1661_v63 = vrot.slane %v4203_v45, 5  ;;  %v2993_v61 = vcombine.low %v3906_v6, %v3909_v7  ;;  %v3114_v6 = vld [vmem:[%s3903_s7 + $0x54] sm:$0xe]  ;;  %4788 = vst [vmem:[#allocation3_spill] sm:$0xff] %v4242_v35 }
  0x55   : > { %v444_v50 = vrot.slane %v443_v46, 4  ;;  %v1655_v58 = vsel %vm4097_vm7, %v1653_v51, %v1654_v49  ;;  %v1665_v24 = vrot.slane %v4218_v59, 5  ;;  %v1668_v1 = vrot.slane %v4221_v0, 5  ;;  %v4245_v60 = vld [vmem:[%s3903_s7 + $0x68] sm:$0x1] }
  0x56   : > { %v439_v52 = vsel %vm3942_vm4, %v434_v15, %v438_v22  ;;  %v3128_v9 = vcombine.low %v1652_v48, %v1655_v58  ;;  %v1659_v10 = vsel %vm4097_vm7, %v3120_v16, %v1658_v53  ;;  %v1660_v41 = vrot.slane %v1658_v53, 4  ;;  %4789 = vst [vmem:[#allocation4_spill] sm:$0xff] %v4245_v60 }
  0x57   : > { %v449_v26 = vsel %vm3942_vm4, %v444_v50, %v448_v47  ;;  %v3121_v22 = vrot.slane %v3113_v2, 9  ;;  %v1667_v40 = vrot.slane %v1665_v24, 4  ;;  %v3122_v43 = vrot.slane %v3114_v6, 9  ;;  %v3115_v47 = vld [vmem:[%s3903_s7 + $0x60] sm:$0xe] }
  0x58   : > { %v2984_v13 = vcombine.low %v439_v52, %v449_v26  ;;  %3507 = vmatmul.mubr.msk.bf16.gmra.mrb[4].mxu0 %vm476_vm3, %v3128_v9  ;;  %v1662_v20 = vsel %vm4097_vm7, %v1660_v41, %v1661_v63  ;;  %v1672_v46 = vrot.slane %v4229_v17, 5  ;;  %v802_v49 = vrot.slane %v3947_v36, 5  ;;  %v768_v2 = vld [vmem:[%s3903_s7 + $0x18] sm:$0xe]  ;;  %v4277_v6 = vld [vmem:[%s4775_s1 + $0x6] sm:$0x3] }
  0x59   : > { %v3129_v33 = vcombine.low %v1659_v10, %v1662_v20  ;;  %v1666_v25 = vsel %vm4097_vm7, %v3121_v22, %v1665_v24  ;;  %v1675_v15 = vrot.slane %v4232_v12, 5  ;;  %v1669_v48 = vsel %vm4097_vm7, %v1667_v40, %v1668_v1  ;;  %v770_v1 = vld [vmem:[%s3903_s7 + $0x30] sm:$0xe] }
  0x5a   : > { %3425 = vmatmul.mubr.msk.bf16.gmra.mrb[12].mxu1 %vm476_vm3, %v2984_v13  ;;  %v1673_v51 = vsel %vm4097_vm7, %v3122_v43, %v1672_v46  ;;  %v1674_v16 = vrot.slane %v1672_v46, 4  ;;  %v1679_v50 = vrot.slane %v4242_v35, 5  ;;  %v2994_v53 = vcombine.low %v3938_v31, %v3947_v36  ;;  %v769_v36 = vld [vmem:[%s3903_s7 + $0x24] sm:$0xe]  ;;  %v4551_v12 = vld [vmem:[%s3903_s7 + $0x70] sm:$0xf] }
  0x5b   : > { %3430 = vmatprep.mubr.msk.bf16.mxu1 %vm476_vm3, %v2993_v61  ;;  %3510 = vmatprep.mubr.msk.bf16.mxu0 %vm476_vm3, %v3129_v33  ;;  %v3130_v63 = vcombine.low %v1666_v25, %v1669_v48  ;;  %v3123_v52 = vrot.slane %v3115_v47, 9  ;;  %v1682_v58 = vrot.slane %v4245_v60, 5  ;;  %v767_v61 = vld [vmem:[%s3903_s7 + $0xc] sm:$0xe]  ;;  %v805_v26 = vrot.slane %v3957_v44, 5 }
  0x5c   : > { %v2995_v9 = vcombine.low %v3986_v21, %v3993_v27  ;;  %v1676_v10 = vsel %vm4097_vm7, %v1674_v16, %v1675_v15  ;;  %v1681_v41 = vrot.slane %v1679_v50, 4  ;;  %v900_v13 = vsel %vm501_vm0, %v4017_v57, 0  ;;  %v3759_v16 = vld [vmem:[%s3903_s7 + $0x18] sm:$0xff]   ;;  %v4523_v60 = vld [vmem:[%s3903_s7 + $0x64] sm:$0xf] }
  0x5d   : > { %v3131_v31 = vcombine.low %v1673_v51, %v1676_v10  ;;  %v3010_v44 = vrot.slane %v767_v61, 9  ;;  %v804_v20 = vrot.slane %v802_v49, 4  ;;  %v3011_v21 = vrot.slane %v768_v2, 9  ;;  %4790 = vst [vmem:[#allocation5_spill] sm:$0xff] %v4523_v60 }
  0x5e   : > { %v1680_v22 = vsel %vm4097_vm7, %v3123_v52, %v1679_v50  ;;  %v1683_v57 = vsel %vm4097_vm7, %v1681_v41, %v1682_v58  ;;  %v809_v24 = vrot.slane %v3993_v27, 5  ;;  %v812_v40 = vrot.slane %v4001_v38, 5 }
  0x5f   : > { %v4290_v33 = vsel %vm4097_vm7, %v3010_v44, %v802_v49  ;;  %v4294_v25 = vsel %vm4097_vm7, %v804_v20, %v805_v26  ;;  %v3012_v43 = vrot.slane %v769_v36, 9  ;;  %v3132_v49 = vcombine.low %v1680_v22, %v1683_v57  ;;  %v3174_v26 = vld [vmem:[%s3903_s7 + $0x18] sm:$0xf]  ;;  %v3761_v57 = vld [vmem:[%s3903_s7 + $0x24] sm:$0xff]  }
  0x60   : > { %3511 = vmatmul.mubr.msk.bf16.gmra.mrb[8].mxu0 %vm476_vm3, %v3130_v63  ;;  %v3019_v27 = vcombine.low %v4290_v33, %v4294_v25  ;;  %v4303_v46 = vsel %vm4097_vm7, %v3011_v21, %v809_v24  ;;  %v811_v47 = vrot.slane %v809_v24, 4  ;;  %v816_v15 = vrot.slane %v4033_v19, 5 }
  0x61   : > { %3514 = vmatprep.mubr.msk.bf16.mxu0 %vm476_vm3, %v3131_v31  ;;  %v819_v48 = vrot.slane %v4043_v29, 5  ;;  %v3013_v38 = vrot.slane %v770_v1, 9  ;;  %v2996_v51 = vcombine.low %v4030_v11, %v4033_v19  ;;  %v826_v63 = vrot.slane %v4079_v39, 5  ;;  %v771_v19 = vld [vmem:[%s3903_s7 + $0x3c] sm:$0xe] }
  0x62   : > { %3431 = vmatmul.mubr.msk.bf16.vlgmr.msra.gmra.mrb[0].mxu1 %vm476_vm3, %v2994_v53  ;;  %v4312_v50 = vsel %vm4097_vm7, %v811_v47, %v812_v40  ;;  %v823_v53 = vrot.slane %v4074_v23, 5  ;;  %v2997_v52 = vcombine.low %v4068_v14, %v4074_v23  ;;  %v4322_v58 = vsel %vm4097_vm7, %v3012_v43, %v816_v15  ;;  %v766_v14 = vld [vmem:[%s3903_s7] sm:$0xe]  ;;  %v4350_v31 = vld [vmem:[%s3903_s7 + $0x1c] sm:$0xf] }
  0x63   : > { %3447 = vmatpush3.bf16.msra.mxu1 %v900_v13  ;;  %3434 = vmatprep.mubr.msk.bf16.mxu1 %vm476_vm3, %v2995_v9  ;;  %v3020_v29 = vcombine.low %v4303_v46, %v4312_v50  ;;  %v818_v11 = vrot.slane %v816_v15, 4  ;;  %v795_v61 = vrot.slane %v3909_v7, 5  ;;  %v3014_v10 = vrot.slane %v771_v19, 9  ;;  %v772_v1 = vld [vmem:[%s3903_s7 + $0x48] sm:$0xe] }
  0x64   : > { %3705 = vmatprep.subr.msk.bf16.mxu1 %vm501_vm0, %v4277_v6  ;;  %v4328_v2 = vsel %vm4097_vm7, %v3013_v38, %v823_v53  ;;  %v825_v39 = vrot.slane %v823_v53, 4  ;;  %v798_v41 = vrot.slane %v3912_v8, 5  ;;  %v3009_v36 = vrot.slane %v766_v14, 9  ;;  %v4376_v38 = vld [vmem:[%s4775_s1 + $0x10] sm:$0x3] }
  0x65   : > { %v4334_v23 = vsel %vm4097_vm7, %v818_v11, %v819_v48  ;;  %v797_v44 = vrot.slane %v795_v61, 4  ;;  %v830_v20 = vrot.slane %v4102_v4, 5  ;;  %v833_v21 = vrot.slane %v4105_v18, 5  ;;  %v4397_v14 = vld [vmem:[%s3903_s7 + $0x28] sm:$0xf] }
  0x66   : > { %v4343_v9 = vsel %vm4097_vm7, %v825_v39, %v826_v63  ;;  %v2998_v22 = vcombine.low %v4091_v56, %v4102_v4  ;;  %v2074_v24 = vshrl.u32 %v3174_v26, 16  ;;  %v2077_v8 = vshll.u32 %v3174_v26, 16  ;;  %v3763_v4 = vld [vmem:[%s3903_s7 + $0x30] sm:$0xff]   ;;  %v4499_v46 = vld [vmem:[%s3903_s7 + $0x44] sm:$0x1] }
  0x67   : > { %v2083_v40 = vshll.u32 %v4350_v31, 16  ;;  %v2087_v43 = vshrl.u32 %v4350_v31, 16  ;;  %v4362_v47 = vsel %vm4097_vm7, %v3014_v10, %v830_v20  ;;  %v2316_v18 = vsel %vm501_vm0, %v4165_v34, 0  ;;  %v3192_v7 = vld [vmem:[%s3903_s7 + $0x60] sm:$0xf] }
  0x68   : > { %3515 = vmatmul.mubr.msk.bf16.gmra.mrb[12].mxu0 %vm476_vm3, %v3132_v49  ;;  %v832_v49 = vrot.slane %v830_v20, 4  ;;  %v2999_v56 = vcombine.low %v4116_v30, %v4132_v62  ;;  %v796_v15 = vsel %vm4097_vm7, %v3009_v36, %v795_v61  ;;  %v799_v48 = vsel %vm4097_vm7, %v797_v44, %v798_v41  ;;  %v4384_v30 = vld [vmem:[%s3903_s7 + $0x20] sm:$0x1]  ;;  %v3177_v61 = vld [vmem:[%s3903_s7 + $0x24] sm:$0xf] }
  0x69   : > { %3520 = vmatprep.mubr.msk.bf16.mxu0 %vm476_vm3, %v3759_v16  ;;  %v3015_v34 = vrot.slane %v772_v1, 9  ;;  %v2076_v16 = vrot.slane %v2074_v24, 4  ;;  %v2079_v53 = vrot.slane %v2077_v8, 5  ;;  %v4390_v11 = vrot.slane %v2083_v40, 5  ;;  %v773_v44 = vld [vmem:[%s3903_s7 + $0x54] sm:$0xe] }
  0x6a   : > { %3435 = vmatmul.mubr.msk.bf16.gmra.mrb[4].mxu1 %vm476_vm3, %v2996_v51  ;;  %v4380_v51 = vsel %vm4097_vm7, %v832_v49, %v833_v21  ;;  %v2089_v19 = vrot.slane %v2087_v43, 4  ;;  %v840_v39 = vrot.slane %v4136_v55, 5  ;;  %v3000_v10 = vcombine.low %v4154_v28, %v4170_v37  ;;  %v3180_v55 = vld [vmem:[%s3903_s7 + $0x30] sm:$0xf]  ;;  %v3765_v20 = vld [vmem:[%s3903_s7 + $0x3c] sm:$0xff]   ;;  %v3766_v1 = vld [vmem:[%s3903_s7 + $0x48] sm:$0xff]  }
  0x6b   : > { %3438 = vmatprep.mubr.msk.bf16.mxu1 %vm476_vm3, %v2997_v52  ;;  %v837_v52 = vrot.slane %v4132_v62, 5  ;;  %v3018_v41 = vcombine.low %v796_v15, %v799_v48  ;;  %v2093_v36 = vshll.u32 %v4384_v30, 16  ;;  %v2080_v21 = vor.u32 %v2079_v53, %v2076_v16  ;;  %v4416_v8 = vld [vmem:[%s3903_s7 + $0x34] sm:$0xf] }
  0x6c   : > { %v2090_v28 = vor.u32 %v2089_v19, %v4390_v11  ;;  %v2107_v40 = vshll.u32 %v4397_v14, 16  ;;  %v2111_v43 = vshrl.u32 %v4397_v14, 16  ;;  %v844_v15 = vrot.slane %v4170_v37, 5 }
  0x6d   : > { %v4401_v62 = vsel %vm4097_vm7, %v3015_v34, %v837_v52  ;;  %v839_v26 = vrot.slane %v837_v52, 4  ;;  %v2131_v48 = vshll.u32 %v4416_v8, 16  ;;  %v2135_v34 = vshrl.u32 %v4416_v8, 16 }
  0x6e   : > { %v847_v16 = vrot.slane %v4179_v54, 5  ;;  %v2081_v53 = vrot.slane %v2080_v21, 4  ;;  %v2095_v52 = vrot.slane %v2093_v36, 5  ;;  %v2091_v37 = vrot.slane %v2090_v28, 4  ;;  %v4439_v36 = vld [vmem:[%s3903_s7 + $0x2c] sm:$0x1] }
  0x6f   : > { %v4413_v24 = vsel %vm4097_vm7, %v839_v26, %v840_v39  ;;  %v4435_v26 = vrot.slane %v2107_v40, 5  ;;  %v4446_v21 = vld [vmem:[%s3903_s7 + $0x38] sm:$0x1]  ;;  %v1099_v28 = vsel %vm501_vm0, %v4277_v6, 0 }
  0x70   : > { %3521 = vmatmul.mubr.msk.bf16.vlgmr.msra.gmra.mrb[0].mxu0 %vm476_vm3, %v3761_v57  ;;  %v2101_v57 = vshll.u32 %v3177_v61, 16  ;;  %v3767_v40 = vld [vmem:[%s3903_s7 + $0x54] sm:$0xff]  }
  0x71   : > { %3537 = vmatpush3.bf16.msra.mxu0 %v2316_v18  ;;  %3524 = vmatprep.mubr.msk.bf16.mxu0 %vm476_vm3, %v3763_v4  ;;  %v2122_v18 = vshrl.u32 %v3180_v55, 16  ;;  %v3016_v4 = vrot.slane %v773_v44, 9 }
  0x72   : > { %3439 = vmatmul.mubr.msk.bf16.gmra.mrb[8].mxu1 %vm476_vm3, %v2998_v22  ;;  %3711 = vmatprep.subr.msk.bf16.mxu0 %vm501_vm0, %v4376_v38  ;;  %v2098_v22 = vshrl.u32 %v3177_v61, 16  ;;  %v846_v61 = vrot.slane %v844_v15, 4  ;;  %v2103_v54 = vrot.slane %v2101_v57, 5  ;;  %v2137_v57 = vrot.slane %v2135_v34, 4  ;;  %v3186_v34 = vld [vmem:[%s3903_s7 + $0x48] sm:$0xf] }
  0x73   : > { %3442 = vmatprep.mubr.msk.bf16.mxu1 %vm476_vm3, %v2999_v56  ;;  %v2125_v56 = vshll.u32 %v3180_v55, 16  ;;  %v4431_v19 = vsel %vm4097_vm7, %v3016_v4, %v844_v15  ;;  %v2113_v55 = vrot.slane %v2111_v43, 4  ;;  %v2124_v44 = vrot.slane %v2122_v18, 4  ;;  %v4457_v43 = vld [vmem:[%s3903_s7 + $0x40] sm:$0xf] }
  0x74   : > { %v2100_v39 = vrot.slane %v2098_v22, 4  ;;  %v4448_v22 = vrot.slane %v2131_v48, 5  ;;  %v3768_v18 = vld [vmem:[%s3903_s7 + $0x60] sm:$0xff]   ;;  %v2096_v4 = vsel %vm3942_vm4, %v2091_v37, %v2095_v52  ;;  %v2117_v48 = vshll.u32 %v4439_v36, 16 }
  0x75   : > { %v2170_v52 = vshrl.u32 %v3186_v34, 16  ;;  %v2173_v37 = vshll.u32 %v3186_v34, 16 }
  0x76   : > { %v2104_v15 = vor.u32 %v2103_v54, %v2100_v39  ;;  %v2138_v63 = vor.u32 %v2137_v57, %v4448_v22  ;;  %v3189_v57 = vld [vmem:[%s3903_s7 + $0x54] sm:$0xf] }
  0x77   : > { %v2172_v50 = vrot.slane %v2170_v52, 4  ;;  %v2197_v34 = vshll.u32 %v3189_v57, 16 }
  0x78   : > { %3525 = vmatmul.mubr.msk.bf16.gmra.mrb[4].mxu0 %vm476_vm3, %v3765_v20  ;;  %v2127_v20 = vrot.slane %v2125_v56, 5  ;;  %v2086_v56 = vsel %vm3942_vm4, %v2081_v53, %v4390_v11  ;;  %v2155_v11 = vshll.u32 %v4457_v43, 16  ;;  %v2159_v53 = vshrl.u32 %v4457_v43, 16 }
  0x79   : > { %3528 = vmatprep.mubr.msk.bf16.mxu0 %vm476_vm3, %v3766_v1  ;;  %v2141_v1 = vshll.u32 %v4446_v21, 16  ;;  %v3199_v54 = vcombine.low %v2086_v56, %v2096_v4  ;;  %v2139_v56 = vrot.slane %v2138_v63, 4  ;;  %v4504_v63 = vld [vmem:[%s3903_s7 + $0x50] sm:$0x1] }
  0x7a   : > { %3443 = vmatmul.mubr.msk.bf16.gmra.mrb[12].mxu1 %vm476_vm3, %v3000_v10  ;;  %v4443_v10 = vsel %vm4097_vm7, %v846_v61, %v847_v16  ;;  %v4468_v16 = vld [vmem:[%s3903_s7 + $0x4c] sm:$0xf]  ;;  %v2114_v61 = vor.u32 %v2113_v55, %v4435_v26  ;;  %v2128_v6 = vor.u32 %v2127_v20, %v2124_v44  ;;  %v2105_v55 = vrot.slane %v2104_v15, 4 }
  0x7b   : > { %3448 = vmatprep.mubr.msk.bf16.mxu1 %vm476_vm3, %v3018_v41  ;;  %v3183_v41 = vld [vmem:[%s3903_s7 + $0x3c] sm:$0xf]  ;;  %v2179_v39 = vshll.u32 %v4468_v16, 16  ;;  %v2119_v44 = vrot.slane %v2117_v48, 5  ;;  %v2183_v20 = vshrl.u32 %v4468_v16, 16  ;;  %v2143_v33 = vrot.slane %v2141_v1, 5 }
  0x7c   : > { %v2146_v49 = vshrl.u32 %v3183_v41, 16  ;;  %v2149_v13 = vshll.u32 %v3183_v41, 16  ;;  %v2115_v41 = vrot.slane %v2114_v61, 4  ;;  %v4492_v15 = vrot.slane %v2155_v11, 5 }
  0x7d   : > { %v2161_v48 = vrot.slane %v2159_v53, 4  ;;  %v2194_v1 = vshrl.u32 %v3189_v57, 16  ;;  %v1368_v11 = vshll.u32 %v4218_v59, 16  ;;  %v2110_v53 = vsel %vm3942_vm4, %v2105_v55, %v4435_v26 }
  0x7e   : > { %v2148_v25 = vrot.slane %v2146_v49, 4  ;;  %v2151_v4 = vrot.slane %v2149_v13, 5  ;;  %v4501_v49 = vrot.slane %v2179_v39, 5  ;;  %v2185_v13 = vrot.slane %v2183_v20, 4 }
  0x7f   : > { %v2120_v52 = vsel %vm3942_vm4, %v2115_v41, %v2119_v44  ;;  %v2162_v57 = vor.u32 %v2161_v48, %v4492_v15  ;;  %v2144_v26 = vsel %vm3942_vm4, %v2139_v56, %v2143_v33  ;;  %v2196_v44 = vrot.slane %v2194_v1, 4  ;;  %v4542_v56 = vld [vmem:[%s3903_s7 + $0x5c] sm:$0x1] }
  0x80   : > { %3529 = vmatmul.mubr.msk.bf16.gmra.mrb[8].mxu0 %vm476_vm3, %v3767_v40  ;;  %v2129_v40 = vrot.slane %v2128_v6, 4  ;;  %v2152_v20 = vor.u32 %v2151_v4, %v2148_v25  ;;  %v2186_v41 = vor.u32 %v2185_v13, %v4501_v49  ;;  %v4792_v33 = vcombine.low %v4328_v2, %v4343_v9 }
  0x81   : > { %3532 = vmatprep.mubr.msk.bf16.mxu0 %vm476_vm3, %v3768_v18  ;;  %v3769_v18 = vld [vmem:[%s3903_s7 + $0x6c] sm:$0xff]   ;;  %v2218_v4 = vshrl.u32 %v3192_v7, 16  ;;  %v1372_v48 = vshrl.u32 %v4218_v59, 16  ;;  %v3200_v13 = vcombine.low %v2110_v53, %v2120_v52 }
  0x82   : > { %3449 = vmatmul.mubr.msk.bf16.vlgmr.msra.gmra.mrb[0].mxu1 %vm476_vm3, %v3019_v27  ;;  %v4489_v27 = vld [vmem:[%s3903_s7 + $0x58] sm:$0xf]  ;;  %v2134_v39 = vsel %vm3942_vm4, %v2129_v40, %v4448_v22  ;;  %v4791_v22 = vcombine.low %v4322_v58, %v4334_v23  ;;  %v2199_v40 = vrot.slane %v2197_v34, 5  ;;  %v2221_v58 = vshll.u32 %v3192_v7, 16 }
  0x83   : > { %3465 = vmatpush3.bf16.msra.mxu1 %v1099_v28  ;;  %3452 = vmatprep.mubr.msk.bf16.mxu1 %vm476_vm3, %v3020_v29  ;;  %v3778_v28 = vld [vmem:[%s4775_s1 + $0x8] sm:$0x3]  ;;  %v2175_v29 = vrot.slane %v2173_v37, 5  ;;  %v2203_v61 = vshll.u32 %v4489_v27, 16  ;;  %v2207_v6 = vshrl.u32 %v4489_v27, 16  ;;  %v2570_v37 = vsel %vm501_vm0, %v4376_v38, 0 }
  0x84   : > { %3707 = vmatprep.subr.msk.bf16.mxu1 %vm501_vm0, %v3778_v28  ;;  %v2165_v28 = vshll.u32 %v4499_v46, 16  ;;  %v2189_v38 = vshll.u32 %v4504_v63, 16  ;;  %v2227_v23 = vshll.u32 %v4523_v60, 16  ;;  %v3201_v34 = vcombine.low %v2134_v39, %v2144_v26 }
  0x85   : > { %v2176_v55 = vor.u32 %v2175_v29, %v2172_v50  ;;  %v4535_v25 = vrot.slane %v2203_v61, 5  ;;  %v2153_v50 = vrot.slane %v2152_v20, 4  ;;  %v2163_v29 = vrot.slane %v2162_v57, 4 }
  0x86   : > { %v2167_v1 = vrot.slane %v2165_v28, 5  ;;  %v2191_v9 = vrot.slane %v2189_v38, 5  ;;  %v2187_v61 = vrot.slane %v2186_v41, 4  ;;  %v2213_v7 = vshll.u32 %v4542_v56, 16  ;;  %v4563_v28 = vld [vmem:[%s3903_s7 + $0x68] sm:$0x1] }
  0x87   : > { %v2177_v2 = vrot.slane %v2176_v55, 4  ;;  %v2220_v35 = vrot.slane %v2218_v4, 4  ;;  %v4553_v59 = vrot.slane %v2227_v23, 5  ;;  %v4555_v57 = vrot.slane %v1368_v11, 5 }
  0x88   : > { %3533 = vmatmul.mubr.msk.bf16.gmra.mrb[12].mxu0 %vm476_vm3, %v3769_v18  ;;  %v2209_v18 = vrot.slane %v2207_v6, 4  ;;  %v2200_v6 = vor.u32 %v2199_v40, %v2196_v44  ;;  %v1374_v53 = vrot.slane %v1372_v48, 4  ;;  %v2158_v52 = vsel %vm3942_vm4, %v2153_v50, %v4492_v15 }
  0x89   : > { %3538 = vmatprep.mubr.msk.bf16.mxu0 %vm476_vm3, %v3199_v54  ;;  %v2231_v54 = vshrl.u32 %v4523_v60, 16  ;;  %v2223_v60 = vrot.slane %v2221_v58, 5  ;;  %v2168_v39 = vsel %vm3942_vm4, %v2163_v29, %v2167_v1  ;;  %v2251_v38 = vshll.u32 %v4551_v12, 16  ;;  %v3770_v1 = vld [vmem:[%s3903_s7 + $0xc] sm:$0xff]  }
  0x8a   : > { %3453 = vmatmul.mubr.msk.bf16.gmra.mrb[4].mxu1 %vm476_vm3, %v4791_v22  ;;  %v2210_v22 = vor.u32 %v2209_v18, %v4535_v25  ;;  %v2255_v44 = vshrl.u32 %v4551_v12, 16  ;;  %v4793_v11 = vcombine.low %v4362_v47, %v4380_v51  ;;  %v2182_v15 = vsel %vm3942_vm4, %v2177_v2, %v4501_v49 }
  0x8b   : > { %3456 = vmatprep.mubr.msk.bf16.mxu1 %vm476_vm3, %v4792_v33  ;;  %v3195_v33 = vld [vmem:[%s3903_s7 + $0x6c] sm:$0xf]  ;;  %v2233_v20 = vrot.slane %v2231_v54, 4  ;;  %v2192_v41 = vsel %vm3942_vm4, %v2187_v61, %v2191_v9  ;;  %v2201_v40 = vrot.slane %v2200_v6, 4  ;;  %v2215_v18 = vrot.slane %v2213_v7, 5 }
  0x8c   : > { %v2242_v26 = vshrl.u32 %v3195_v33, 16  ;;  %v2245_v55 = vshll.u32 %v3195_v33, 16  ;;  %v4794_v4 = vcombine.low %v4401_v62, %v4413_v24  ;;  %v2211_v47 = vrot.slane %v2210_v22, 4  ;;  %v3082_v22 = vld [vmem:[%s3903_s7 + $0x48] sm:$0xf] }
  0x8d   : > { %v2224_v51 = vor.u32 %v2223_v60, %v2220_v35  ;;  %v2237_v49 = vshll.u32 %v4563_v28, 16  ;;  %v1375_v58 = vor.u32 %v1374_v53, %v4555_v57  ;;  %v1378_v23 = vshll.u32 %v4221_v0, 16  ;;  %v4592_v60 = vld [vmem:[%s3903_s7 + $0x74] sm:$0x1] }
  0x8e   : > { %v3202_v54 = vcombine.low %v2158_v52, %v2168_v39  ;;  %v2244_v48 = vrot.slane %v2242_v26, 4  ;;  %v2247_v62 = vrot.slane %v2245_v55, 5  ;;  %v4586_v24 = vrot.slane %v2251_v38, 5 }
  0x8f   : > { %v2257_v50 = vrot.slane %v2255_v44, 4  ;;  %v3203_v29 = vcombine.low %v2182_v15, %v2192_v41  ;;  %v2206_v35 = vsel %vm3942_vm4, %v2201_v40, %v4535_v25  ;;  %v2225_v0 = vrot.slane %v2224_v51, 4  ;;  %v3772_v51 = vld [vmem:[%s3903_s7 + $0x24] sm:$0xff]  }
  0x90   : > { %3539 = vmatmul.mubr.msk.bf16.vlgmr.msra.gmra.mrb[0].mxu0 %vm476_vm3, %v3200_v13  ;;  %v2216_v13 = vsel %vm3942_vm4, %v2211_v47, %v2215_v18  ;;  %v2239_v2 = vrot.slane %v2237_v49, 5  ;;  %v1376_v9 = vrot.slane %v1375_v58, 4  ;;  %v1380_v61 = vrot.slane %v1378_v23, 5 }
  0x91   : > { %3555 = vmatpush3.bf16.msra.mxu0 %v2570_v37  ;;  %3542 = vmatprep.mubr.msk.bf16.mxu0 %vm476_vm3, %v3201_v34  ;;  %v2234_v37 = vor.u32 %v2233_v20, %v4553_v59  ;;  %v2465_v6 = vrot.slane %v4350_v31, 5  ;;  %v2248_v7 = vor.u32 %v2247_v62, %v2244_v48  ;;  %v2258_v33 = vor.u32 %v2257_v50, %v4586_v24  ;;  %v3215_v20 = vld [vmem:[%s3903_s7 + $0x18] sm:$0xe]  ;;  %v3217_v62 = vld [vmem:[%s3903_s7 + $0x30] sm:$0xe] }
  0x92   : > { %3457 = vmatmul.mubr.msk.bf16.gmra.mrb[8].mxu1 %vm476_vm3, %v4793_v11  ;;  %v2261_v25 = vshll.u32 %v4592_v60, 16  ;;  %v4795_v53 = vcombine.low %v4431_v19, %v4443_v10  ;;  %v3204_v52 = vcombine.low %v2206_v35, %v2216_v13  ;;  %v2230_v31 = vsel %vm3942_vm4, %v2225_v0, %v4553_v59  ;;  %v3771_v59 = vld [vmem:[%s3903_s7 + $0x18] sm:$0xff]  }
  0x93   : > { %3460 = vmatprep.mubr.msk.bf16.mxu1 %vm476_vm3, %v4794_v4  ;;  %v2235_v34 = vrot.slane %v2234_v37, 4  ;;  %v1359_v26 = vshrl.u32 %v3082_v22, 16  ;;  %v1362_v55 = vshll.u32 %v3082_v22, 16  ;;  %v3223_v19 = vrot.slane %v3215_v20, 9  ;;  %v3079_v4 = vld [vmem:[%s3903_s7 + $0x3c] sm:$0xf] }
  0x94   : > { %v2467_v10 = vrot.slane %v2465_v6, 4  ;;  %v2468_v38 = vrot.slane %v4384_v30, 5  ;;  %v1381_v44 = vsel %vm3942_vm4, %v1376_v9, %v1380_v61  ;;  %v2249_v11 = vrot.slane %v2248_v7, 4  ;;  %v3216_v30 = vld [vmem:[%s3903_s7 + $0x24] sm:$0xe]  ;;  %v3773_v22 = vld [vmem:[%s3903_s7 + $0x30] sm:$0xff]  }
  0x95   : > { %v2240_v39 = vsel %vm3942_vm4, %v2235_v34, %v2239_v2  ;;  %v2259_v15 = vrot.slane %v2258_v33, 4  ;;  %v2263_v41 = vrot.slane %v2261_v25, 5  ;;  %v1361_v40 = vrot.slane %v1359_v26, 4  ;;  %v3774_v20 = vld [vmem:[%s3903_s7 + $0x3c] sm:$0xff]   ;;  %v3085_v26 = vld [vmem:[%s3903_s7 + $0x54] sm:$0xf] }
  0x96   : > { %v3205_v18 = vcombine.low %v2230_v31, %v2240_v39  ;;  %v1364_v47 = vrot.slane %v1362_v55, 5  ;;  %v2466_v37 = vsel %vm4097_vm7, %v3223_v19, %v2465_v6  ;;  %v2469_v49 = vsel %vm4097_vm7, %v2467_v10, %v2468_v38  ;;  %v3219_v38 = vld [vmem:[%s3903_s7 + $0x48] sm:$0xe] }
  0x97   : > { %v2472_v58 = vrot.slane %v4397_v14, 5  ;;  %v2264_v48 = vsel %vm3942_vm4, %v2259_v15, %v2263_v41  ;;  %v2479_v50 = vrot.slane %v4416_v8, 5  ;;  %v1338_v35 = vshll.u32 %v3079_v4, 16 }
  0x98   : > { %3543 = vmatmul.mubr.msk.bf16.gmra.mrb[4].mxu0 %vm476_vm3, %v3202_v54  ;;  %v1365_v23 = vor.u32 %v1364_v47, %v1361_v40  ;;  %v2254_v54 = vsel %vm3942_vm4, %v2249_v11, %v4586_v24  ;;  %v1344_v14 = vshll.u32 %v4200_v42, 16  ;;  %v3224_v24 = vrot.slane %v3216_v30, 9 }
  0x99   : > { %3546 = vmatprep.mubr.msk.bf16.mxu0 %vm476_vm3, %v3203_v29  ;;  %v1335_v29 = vshrl.u32 %v3079_v4, 16  ;;  %v2475_v8 = vrot.slane %v4439_v36, 5  ;;  %v3232_v0 = vcombine.low %v2466_v37, %v2469_v49  ;;  %v2474_v34 = vrot.slane %v2472_v58, 4  ;;  %v3775_v37 = vld [vmem:[%s3903_s7 + $0x48] sm:$0xff]  }
  0x9a   : > { %3461 = vmatmul.mubr.msk.bf16.gmra.mrb[12].mxu1 %vm476_vm3, %v4795_v53  ;;  %v1366_v13 = vrot.slane %v1365_v23, 4  ;;  %v3225_v2 = vrot.slane %v3217_v62, 9  ;;  %v3206_v61 = vcombine.low %v2254_v54, %v2264_v48  ;;  %v2481_v6 = vrot.slane %v2479_v50, 4  ;;  %v3776_v23 = vld [vmem:[%s3903_s7 + $0x54] sm:$0xff]  }
  0x9b   : > { %3466 = vmatprep.mubr.msk.bf16.mxu1 %vm476_vm3, %v3770_v1  ;;  %v1348_v1 = vshrl.u32 %v4200_v42, 16  ;;  %v2482_v42 = vrot.slane %v4446_v21, 5  ;;  %v1337_v7 = vrot.slane %v1335_v29, 4  ;;  %v1340_v33 = vrot.slane %v1338_v35, 5 }
  0x9c   : > { %v1371_v9 = vsel %vm3942_vm4, %v1366_v13, %v4555_v57  ;;  %v4648_v25 = vrot.slane %v1344_v14, 5  ;;  %v2473_v53 = vsel %vm4097_vm7, %v3224_v24, %v2472_v58  ;;  %v2476_v57 = vsel %vm4097_vm7, %v2474_v34, %v2475_v8  ;;  %v3220_v24 = vld [vmem:[%s3903_s7 + $0x54] sm:$0xe]  ;;  %v4796_v8 = vld [vmem:[#allocation5_spill] sm:$0xff] }
  0x9d   : > { %v1350_v36 = vrot.slane %v1348_v1, 4  ;;  %v2480_v21 = vsel %vm4097_vm7, %v3225_v2, %v2479_v50  ;;  %v2486_v31 = vrot.slane %v4457_v43, 5  ;;  %v1354_v39 = vshll.u32 %v4203_v45, 16  ;;  %v3088_v50 = vld [vmem:[%s3903_s7 + $0x60] sm:$0xf] }
  0x9e   : > { %v2483_v55 = vsel %vm4097_vm7, %v2481_v6, %v2482_v42  ;;  %v1341_v19 = vor.u32 %v1340_v33, %v1337_v7  ;;  %v3233_v43 = vcombine.low %v2473_v53, %v2476_v57  ;;  %v2489_v11 = vrot.slane %v4499_v46, 5  ;;  %v4798_v33 = vld [vmem:[#allocation2_spill] sm:$0xff] }
  0x9f   : > { %v1351_v10 = vor.u32 %v1350_v36, %v4648_v25  ;;  %v1383_v15 = vshrl.u32 %v3085_v26, 16  ;;  %v1386_v41 = vshll.u32 %v3085_v26, 16  ;;  %v1392_v40 = vshll.u32 %v4229_v17, 16 }
  0xa0   : > { %3547 = vmatmul.mubr.msk.bf16.gmra.mrb[8].mxu0 %vm476_vm3, %v3204_v52  ;;  %v3218_v52 = vld [vmem:[%s3903_s7 + $0x3c] sm:$0xe]  ;;  %v2488_v4 = vrot.slane %v2486_v31, 4  ;;  %v1356_v47 = vrot.slane %v1354_v39, 5  ;;  %v2496_v58 = vrot.slane %v4504_v63, 5  ;;  %v2500_v63 = vrot.slane %v4489_v27, 5 }
  0xa1   : > { %3550 = vmatprep.mubr.msk.bf16.mxu0 %vm476_vm3, %v3205_v18  ;;  %v3226_v45 = vrot.slane %v3218_v52, 9  ;;  %v3234_v18 = vcombine.low %v2480_v21, %v2483_v55  ;;  %v1352_v49 = vrot.slane %v1351_v10, 4  ;;  %v1385_v46 = vrot.slane %v1383_v15, 4  ;;  %v3221_v27 = vld [vmem:[%s3903_s7 + $0x60] sm:$0xe] }
  0xa2   : > { %3467 = vmatmul.mubr.msk.bf16.vlgmr.msra.gmra.mrb[0].mxu1 %vm476_vm3, %v3771_v59  ;;  %v1396_v59 = vshrl.u32 %v4229_v17, 16  ;;  %v1388_v54 = vrot.slane %v1386_v41, 5  ;;  %v1394_v48 = vrot.slane %v1392_v40, 5  ;;  %v2490_v29 = vsel %vm4097_vm7, %v2488_v4, %v2489_v11  ;;  %v3777_v52 = vld [vmem:[%s3903_s7 + $0x60] sm:$0xff]  }
  0xa3   : > { %3573 = vmatpush3.bf16.msra.mxu1 %v3881_v3  ;;  %3470 = vmatprep.mubr.msk.bf16.mxu1 %vm476_vm3, %v3772_v51  ;;  %v4645_v3 = vcombine.low %v1371_v9, %v1381_v44  ;;  %v2493_v44 = vrot.slane %v4468_v16, 5  ;;  %v3227_v51 = vrot.slane %v3219_v38, 9  ;;  %v1342_v16 = vrot.slane %v1341_v19, 4  ;;  %v4797_v9 = vld [vmem:[#allocation3_spill] sm:$0xff] }
  0xa4   : > { %v1398_v62 = vrot.slane %v1396_v59, 4  ;;  %v2487_v17 = vsel %vm4097_vm7, %v3226_v45, %v2486_v31  ;;  %v1357_v1 = vsel %vm3942_vm4, %v1352_v49, %v1356_v47  ;;  %v1407_v34 = vshrl.u32 %v3088_v50, 16  ;;  %v3222_v47 = vld [vmem:[%s3903_s7 + $0x6c] sm:$0xe]  ;;  %s2974_s7 = sshll.u32 %s4811_s13, 1 }
  0xa5   : > { %v2495_v30 = vrot.slane %v2493_v44, 4  ;;  %v2494_v35 = vsel %vm4097_vm7, %v3227_v51, %v2493_v44  ;;  %v1347_v14 = vsel %vm3942_vm4, %v1342_v16, %v4648_v25  ;;  %v1410_v2 = vshll.u32 %v3088_v50, 16  ;;  %s226_s8 = sadd.s32 %s2974_s7, %s3891_s25 }
  0xa6   : > { %v1420_v6 = vshrl.u32 %v4797_v9, 16  ;;  %v3235_v42 = vcombine.low %v2487_v17, %v2490_v29  ;;  %v1399_v7 = vor.u32 %v1398_v62, %v1394_v48  ;;  %v1402_v25 = vshll.u32 %v4798_v33, 16  ;;  %s2975_s9 = sshll.u32 %s226_s8, 1 }
  0xa7   : > { %v2497_v13 = vsel %vm4097_vm7, %v2495_v30, %v2496_v58  ;;  %v2502_v53 = vrot.slane %v2500_v63, 4  ;;  %v2503_v57 = vrot.slane %v4542_v56, 5  ;;  %v3096_v21 = vcombine.low %v1347_v14, %v1357_v1  ;;  %s228_s19 = scalar_lea.vmem %s4777_s3, %s2975_s9 }
  0xa8   : > { %3551 = vmatmul.mubr.msk.bf16.gmra.mrb[12].mxu0 %vm476_vm3, %v3206_v61  ;;  %v1416_v61 = vshll.u32 %v4797_v9, 16  ;;  %v3236_v36 = vcombine.low %v2494_v35, %v2497_v13  ;;  %v3229_v31 = vrot.slane %v3221_v27, 9  ;;  %v2510_v26 = vrot.slane %v4563_v28, 5 }
  0xa9   : > { %3556 = vmatprep.mubr.msk.bf16.mxu0 %vm476_vm3, %v3232_v0  ;;  %v2507_v0 = vrot.slane %v4796_v8, 5  ;;  %v1409_v55 = vrot.slane %v1407_v34, 4  ;;  %v1412_v19 = vrot.slane %v1410_v2, 5  ;;  %v1422_v38 = vrot.slane %v1420_v6, 4 }
  0xaa   : > { %3471 = vmatmul.mubr.msk.bf16.gmra.mrb[4].mxu1 %vm476_vm3, %v3773_v22  ;;  %v1389_v22 = vor.u32 %v1388_v54, %v1385_v46  ;;  %v1418_v10 = vrot.slane %v1416_v61, 5  ;;  %v1404_v45 = vrot.slane %v1402_v25, 5  ;;  %v2504_v28 = vsel %vm4097_vm7, %v2502_v53, %v2503_v57 }
  0xab   : > { %3474 = vmatprep.mubr.msk.bf16.mxu1 %vm476_vm3, %v3774_v20  ;;  %v3228_v20 = vrot.slane %v3220_v24, 9  ;;  %v2509_v39 = vrot.slane %v2507_v0, 4  ;;  %v2508_v11 = vsel %vm4097_vm7, %v3229_v31, %v2507_v0  ;;  %v2514_v15 = vrot.slane %v4551_v12, 5 }
  0xac   : > { %v1390_v44 = vrot.slane %v1389_v22, 4  ;;  %v1413_v40 = vor.u32 %v1412_v19, %v1409_v55  ;;  %v1423_v59 = vor.u32 %v1422_v38, %v1418_v10  ;;  %v3230_v30 = vrot.slane %v3222_v47, 9 }
  0xad   : > { %v2501_v56 = vsel %vm4097_vm7, %v3228_v20, %v2500_v63  ;;  %v2511_v41 = vsel %vm4097_vm7, %v2509_v39, %v2510_v26  ;;  %v2516_v12 = vrot.slane %v2514_v15, 4  ;;  %v2517_v58 = vrot.slane %v4592_v60, 5 }
  0xae   : > { %v1395_v51 = vsel %vm3942_vm4, %v1390_v44, %v1394_v48  ;;  %v3237_v16 = vcombine.low %v2501_v56, %v2504_v28  ;;  %v3238_v49 = vcombine.low %v2508_v11, %v2511_v41  ;;  %v1414_v46 = vrot.slane %v1413_v40, 4 }
  0xaf   : > { %v1424_v54 = vrot.slane %v1423_v59, 4  ;;  %v2515_v48 = vsel %vm4097_vm7, %v3230_v30, %v2514_v15  ;;  %v2518_v50 = vsel %vm4097_vm7, %v2516_v12, %v2517_v58 }
  0xb0   : > { %3557 = vmatmul.mubr.msk.bf16.vlgmr.msra.gmra.mrb[0].mxu0 %vm476_vm3, %v3233_v43  ;;  %v1400_v43 = vrot.slane %v1399_v7, 4  ;;  %v1419_v60 = vsel %vm3942_vm4, %v1414_v46, %v1418_v10  ;;  %v3239_v29 = vcombine.low %v2515_v48, %v2518_v50 }
  0xb1   : > { %3560 = vmatprep.mubr.msk.bf16.mxu0 %vm476_vm3, %v3234_v18  ;;  %v4799_v18 = vld [vmem:[#allocation4_spill] sm:$0xff] }
  0xb2   : > { %3475 = vmatmul.mubr.msk.bf16.gmra.mrb[8].mxu1 %vm476_vm3, %v3775_v37  ;;  %v1426_v4 = vshll.u32 %v4799_v18, 16  ;;  %v1405_v37 = vsel %vm3942_vm4, %v1400_v43, %v1404_v45 }
  0xb3   : > { %3478 = vmatprep.mubr.msk.bf16.mxu1 %vm476_vm3, %v3776_v23  ;;  %v3098_v23 = vcombine.low %v1395_v51, %v1405_v37 }
  0xb4   : > { %v1428_v62 = vrot.slane %v1426_v4, 5 }
  0xb6   : > { %v1429_v17 = vsel %vm3942_vm4, %v1424_v54, %v1428_v62 }
  0xb7   : > { %v3099_v35 = vcombine.low %v1419_v60, %v1429_v17 }
  0xb8   : > { %3561 = vmatmul.mubr.msk.bf16.gmra.mrb[4].mxu0 %vm476_vm3, %v3235_v42 }
  0xb9   : > { %3564 = vmatprep.mubr.msk.bf16.mxu0 %vm476_vm3, %v3236_v36 }
  0xba   : > { %3479 = vmatmul.mubr.msk.bf16.gmra.mrb[12].mxu1 %vm476_vm3, %v3777_v52 }
  0xbb   : > { %3492 = vmatprep.mubr.msk.bf16.mxu1 %vm476_vm3, %v3096_v21 }
  0xc0   : > { %3565 = vmatmul.mubr.msk.bf16.gmra.mrb[8].mxu0 %vm476_vm3, %v3237_v16 }
  0xc1   : > { %3568 = vmatprep.mubr.msk.bf16.mxu0 %vm476_vm3, %v3238_v49 }
  0xc2   : > { %3493 = vmatmul.mubr.msk.bf16.vlgmr.msra.gmra.mrb[8].mxu1 %vm476_vm3, %v4645_v3 }
  0xc3   : > { %3496 = vmatprep.mubr.msk.bf16.mxu1 %vm476_vm3, %v3098_v23 }
  0xc8   : > { %3569 = vmatmul.mubr.msk.bf16.gmra.mrb[12].mxu0 %vm476_vm3, %v3239_v29 }
  0xca   : > { %3497 = vmatmul.mubr.msk.bf16.gmra.mrb[12].mxu1 %vm476_vm3, %v3099_v35 }
 0x175   : > { %v3468_v3 = vpop.f32.mrb[0].mxu1 }
 0x176   : > { %v1135_v63 = vpop.f32.mrb[1].mxu1 }
 0x177   : > { %v3469_v14 = vpop.f32.mrb[2].mxu1 }
 0x178   : > { %v1138_v5 = vpop.f32.mrb[3].mxu1 }
 0x17d   : > { %v3472_v1 = vpop.f32.mrb[4].mxu1 }
 0x17e   : > { %v1151_v13 = vpop.f32.mrb[5].mxu1 }
 0x17f   : > { %v3473_v24 = vpop.f32.mrb[6].mxu1 }
 0x180   : > { %v1154_v32 = vpop.f32.mrb[7].mxu1 }
 0x183   : > { %v3558_v8 = vpop.f32.mrb[0].mxu0 }
 0x184   : > { %v3574_v0 = vadd.f32 %v3558_v8, %v3468_v3  ;;  %v2606_v27 = vpop.f32.mrb[1].mxu0 }
 0x185   : > { %v3575_v34 = vadd.f32 %v2606_v27, %v1135_v63  ;;  %v3559_v2 = vpop.f32.mrb[2].mxu0 }
 0x186   : > { %v3576_v9 = vadd.f32 %v3559_v2, %v3469_v14  ;;  %v2609_v61 = vpop.f32.mrb[3].mxu0  ;;  %v2709_v36 = vmul.f32 %v3574_v0, %v3574_v0 }
 0x187   : > { %v3577_v6 = vadd.f32 %v2609_v61, %v1138_v5  ;;  %v2707_v22 = vmul.f32 %v3575_v34, %v3575_v34 }
 0x188   : > { %v3290_v42 = vpack.c.bf16 %v3576_v9, %v3574_v0  ;;  %v2710_v31 = vmul.f32 %v3576_v9, %v3576_v9 }
 0x189   : > { %v2685_v7 = vadd.f32 %v3577_v6, %v3575_v34  ;;  %v2708_v33 = vmul.f32 %v3577_v6, %v3577_v6  ;;  %v3285_v25 = vpack.c.bf16 %v3577_v6, %v3575_v34 }
 0x18a   : > { %3322 = vst [vmem:[%s4744_s12 + $0x8] sm:$0xff] %v3290_v42  }
 0x18b   : > { %v2686_v20 = vadd.f32 %v3574_v0, %v2685_v7  ;;  %v2723_v53 = vadd.f32 %v2708_v33, %v2707_v22  ;;  %3286 = vst [vmem:[%s4744_s12] sm:$0xff] %v3285_v25   ;;  %v3562_v57 = vpop.f32.mrb[4].mxu0 }
 0x18c   : > { %v3578_v52 = vadd.f32 %v3562_v57, %v3472_v1  ;;  %v2622_v21 = vpop.f32.mrb[5].mxu0 }
 0x18d   : > { %v2724_v39 = vadd.f32 %v2723_v53, %v2709_v36  ;;  %v3579_v26 = vadd.f32 %v2622_v21, %v1151_v13  ;;  %v2687_v55 = vadd.f32 %v3576_v9, %v2686_v20  ;;  %v3563_v19 = vpop.f32.mrb[6].mxu0 }
 0x18e   : > { %v3580_v10 = vadd.f32 %v3563_v19, %v3473_v24  ;;  %v2625_v38 = vpop.f32.mrb[7].mxu0  ;;  %v2713_v59 = vmul.f32 %v3578_v52, %v3578_v52 }
 0x18f   : > { %v2688_v44 = vadd.f32 %v3579_v26, %v2687_v55  ;;  %v2711_v43 = vmul.f32 %v3579_v26, %v3579_v26  ;;  %v2725_v45 = vadd.f32 %v2724_v39, %v2710_v31  ;;  %v3581_v56 = vadd.f32 %v2625_v38, %v1154_v32 }
 0x190   : > { %v3300_v28 = vpack.c.bf16 %v3580_v10, %v3578_v52  ;;  %v2714_v16 = vmul.f32 %v3580_v10, %v3580_v10 }
 0x191   : > { %v2726_v11 = vadd.f32 %v2725_v45, %v2711_v43  ;;  %v2689_v15 = vadd.f32 %v3581_v56, %v2688_v44  ;;  %v2712_v41 = vmul.f32 %v3581_v56, %v3581_v56  ;;  %v3295_v40 = vpack.c.bf16 %v3581_v56, %v3579_v26 }
 0x192   : > { %3324 = vst [vmem:[%s4744_s12 + $0x18] sm:$0xff] %v3300_v28  }
 0x193   : > { %v2690_v18 = vadd.f32 %v3578_v52, %v2689_v15  ;;  %v2727_v4 = vadd.f32 %v2726_v11, %v2712_v41  ;;  %3323 = vst [vmem:[%s4744_s12 + $0x10] sm:$0xff] %v3295_v40   ;;  %v3566_v47 = vpop.f32.mrb[8].mxu0 }
 0x194   : > { %v2638_v37 = vpop.f32.mrb[9].mxu0 }
 0x195   : > { %v3494_v51 = vpop.f32.mrb[8].mxu1  ;;  %v2728_v49 = vadd.f32 %v2727_v4, %v2713_v59  ;;  %v2691_v58 = vadd.f32 %v3580_v10, %v2690_v18  ;;  %v3567_v23 = vpop.f32.mrb[10].mxu0 }
 0x196   : > { %v3582_v30 = vadd.f32 %v3566_v47, %v3494_v51  ;;  %v1549_v12 = vpop.f32.mrb[9].mxu1  ;;  %v2641_v62 = vpop.f32.mrb[11].mxu0 }
 0x197   : > { %v3583_v46 = vadd.f32 %v2638_v37, %v1549_v12  ;;  %v3495_v54 = vpop.f32.mrb[10].mxu1  ;;  %v2729_v48 = vadd.f32 %v2728_v49, %v2714_v16 }
 0x198   : > { %v3584_v50 = vadd.f32 %v3567_v23, %v3495_v54  ;;  %v1552_v60 = vpop.f32.mrb[11].mxu1  ;;  %v2717_v24 = vmul.f32 %v3582_v30, %v3582_v30 }
 0x199   : > { %v2692_v17 = vadd.f32 %v3583_v46, %v2691_v58  ;;  %v2715_v29 = vmul.f32 %v3583_v46, %v3583_v46  ;;  %v3585_v35 = vadd.f32 %v2641_v62, %v1552_v60 }
 0x19a   : > { %v3310_v3 = vpack.c.bf16 %v3584_v50, %v3582_v30  ;;  %v2718_v61 = vmul.f32 %v3584_v50, %v3584_v50 }
 0x19b   : > { %v2730_v63 = vadd.f32 %v2729_v48, %v2715_v29  ;;  %v2693_v14 = vadd.f32 %v3585_v35, %v2692_v17  ;;  %v2716_v5 = vmul.f32 %v3585_v35, %v3585_v35  ;;  %v3305_v1 = vpack.c.bf16 %v3585_v35, %v3583_v46  ;;  %v3570_v13 = vpop.f32.mrb[12].mxu0 }
 0x19c   : > { %3326 = vst [vmem:[%s4744_s12 + $0x28] sm:$0xff] %v3310_v3   ;;  %v2654_v27 = vpop.f32.mrb[13].mxu0 }
 0x19d   : > { %v2694_v32 = vadd.f32 %v3582_v30, %v2693_v14  ;;  %v2731_v8 = vadd.f32 %v2730_v63, %v2716_v5  ;;  %3325 = vst [vmem:[%s4744_s12 + $0x20] sm:$0xff] %v3305_v1   ;;  %v3498_v0 = vpop.f32.mrb[12].mxu1  ;;  %v3571_v9 = vpop.f32.mrb[14].mxu0 }
 0x19e   : > { %v3586_v34 = vadd.f32 %v3570_v13, %v3498_v0  ;;  %v1565_v2 = vpop.f32.mrb[13].mxu1  ;;  %v2657_v33 = vpop.f32.mrb[15].mxu0 }
 0x19f   : > { %v2732_v6 = vadd.f32 %v2731_v8, %v2717_v24  ;;  %v3587_v42 = vadd.f32 %v2654_v27, %v1565_v2  ;;  %v2695_v22 = vadd.f32 %v3584_v50, %v2694_v32  ;;  %v3499_v7 = vpop.f32.mrb[14].mxu1 }
 0x1a0   : > { %v3588_v25 = vadd.f32 %v3571_v9, %v3499_v7  ;;  %v1568_v36 = vpop.f32.mrb[15].mxu1  ;;  %v2721_v19 = vmul.f32 %v3586_v34, %v3586_v34 }
 0x1a1   : > { %v2696_v20 = vadd.f32 %v3587_v42, %v2695_v22  ;;  %v2719_v53 = vmul.f32 %v3587_v42, %v3587_v42  ;;  %v2733_v57 = vadd.f32 %v2732_v6, %v2718_v61  ;;  %v3589_v52 = vadd.f32 %v2657_v33, %v1568_v36 }
 0x1a2   : > { %v3320_v21 = vpack.c.bf16 %v3588_v25, %v3586_v34  ;;  %v2722_v44 = vmul.f32 %v3588_v25, %v3588_v25 }
 0x1a3   : > { %v2734_v31 = vadd.f32 %v2733_v57, %v2719_v53  ;;  %v2697_v39 = vadd.f32 %v3589_v52, %v2696_v20  ;;  %v2720_v26 = vmul.f32 %v3589_v52, %v3589_v52  ;;  %v3315_v55 = vpack.c.bf16 %v3589_v52, %v3587_v42 }
 0x1a4   : > { %3328 = vst [vmem:[%s4744_s12 + $0x38] sm:$0xff] %v3320_v21  }
 0x1a5   : > { %v2698_v10 = vadd.f32 %v3586_v34, %v2697_v39  ;;  %v2735_v38 = vadd.f32 %v2734_v31, %v2720_v26  ;;  %3327 = vst [vmem:[%s4744_s12 + $0x30] sm:$0xff] %v3315_v55  }
 0x1a7   : > { %v2699_v43 = vadd.f32 %v3588_v25, %v2698_v10  ;;  %v2736_v45 = vadd.f32 %v2735_v38, %v2721_v19 }
 0x1a9   : > { %v2700_v56 = vrot.slane %v2699_v43, 4  ;;  %v2737_v28 = vadd.f32 %v2736_v45, %v2722_v44 }
 0x1ab   : > { %v2701_v11 = vadd.f32 %v2700_v56, %v2699_v43  ;;  %v2738_v15 = vrot.slane %v2737_v28, 4 }
 0x1ad   : > { %v2702_v41 = vrot.slane %v2701_v11, 2  ;;  %v2739_v40 = vadd.f32 %v2738_v15, %v2737_v28 }
 0x1af   : > { %v2703_v59 = vadd.f32 %v2702_v41, %v2701_v11  ;;  %v2740_v18 = vrot.slane %v2739_v40, 2 }
 0x1b1   : > { %v2704_v4 = vrot.slane %v2703_v59, 1  ;;  %v2741_v47 = vadd.f32 %v2740_v18, %v2739_v40 }
 0x1b3   : > { %v2705_v51 = vadd.f32 %v2704_v4, %v2703_v59  ;;  %v2742_v37 = vrot.slane %v2741_v47, 1 }
 0x1b5   : > { %2706 = vst [vmem:[%s228_s19] sm:$0x1] %v2705_v51  ;;  %v2743_v16 = vadd.f32 %v2742_v37, %v2741_v47 }
 0x1b7   : > { %2744 = vst [vmem:[%s228_s19 + $0x1] sm:$0x1] %v2743_v16 }
 0x1b8 PF: > { %s14_s16 = sadd.s32 1, %s3817_s16   ;;  %s4800_s12 = smov %s3809_s14 }
 0x1b9   : > { %p11_p8 = scmp.ge.s32.totalorder %s14_s16, 6   ;;  %s4801_s13 = smov %s3813_s15 }
 0x1ba   : > { %s4802_s14 = smov %s4805_s17  ;;  %s4803_s15 = smov %s4809_s18 }
 0x1bb   :  { %13 = sbr.rel (!%p11_p8) target bundleno = 3 (0x3), region = 80 }

</bundles_post_ra>
